<compile_context>
chip_gen: v7x
topology: tpu7x:2x2x1
jax: 0.10.0
libtpu: 0.0.40
codegen_flags: <defaults>
</compile_context>

<pallas_src>
import functools

import jax
import jax.numpy as jnp
from jax import lax
from jax.experimental import pallas as pl
from jax.experimental.pallas import tpu as pltpu

EDGE_TILE = 256  # edge-tile size == contraction depth of the scatter/gather matmuls


# ----------------------------------------------------------------------------
# Kernel: one edge tile per grid step; accumulate segment sums; finalize last.
# ----------------------------------------------------------------------------
def _layerset_kernel(
    n_edges, n_unique, hidden,            # static (closed over via partial)
    z_ref,            # [N, Cin]   node features (resident)
    colu_ref,         # [1, TU]    unique-edge col (lane-dense)
    rowu_ref,         # [1, TU]    unique-edge row
    tfT_ref,          # [T, TU]    temporal features, transposed
    col_ref,          # [1, TS]    edge col
    row_ref,          # [1, TS]    edge row
    td_ref,           # [1, TS]    time diffs
    w_t_mp_ref,       # [Cin, H]
    w_tmp_ref,        # [T, H]
    b_mp_ref,         # [1, H]     b_t_mp + b_tmp (per-edge bias)
    w_n_aug_ref,      # [Cin, H+1] W_N with a zero column appended
    b_n_aug_ref,      # [1, H+1]   b_N with 1 appended (td counter column)
    w_s_both_ref,     # [Cin, 2H]  [W_S(mp) | W_S(sf)]
    b_s_both_ref,     # [1, 2H]
    w_f1a_ref, w_f1b_ref, b_f1_ref,       # fusion lin1 (r_u / gamma_u halves)
    w_f2_ref, b_f2_ref,                   # fusion lin2
    out_ref,          # [N, Cin]
    acc_mp_ref,       # [N, H]    f32 message-passing segment sums
    acc_sf_ref,       # [N, H+1]  f32 [sum(neigh*td) | sum(td)]
    zw_t_ref,         # [N, H]    f32 z @ W_T (hoisted projection)
    zw_n_ref,         # [N, H+1]  f32 z @ W_N_aug
    nid_ref,          # [N, 1]    i32 node ids (built once)
):
    f32 = jnp.float32
    N = z_ref.shape[0]
    H = hidden
    TU = colu_ref.shape[1]
    TS = col_ref.shape[1]
    k = pl.program_id(0)
    dn0 = (((0,), (0,)), ((), ()))   # contract over dim 0 of both operands

    @pl.when(k == 0)
    def _init():
        acc_mp_ref[...] = jnp.zeros_like(acc_mp_ref)
        acc_sf_ref[...] = jnp.zeros_like(acc_sf_ref)
        nid_ref[...] = lax.broadcasted_iota(jnp.int32, (N, 1), 0)
        z0 = z_ref[...]
        zw_t_ref[...] = jnp.dot(z0, w_t_mp_ref[...], preferred_element_type=f32)
        zw_n_ref[...] = jnp.dot(z0, w_n_aug_ref[...], preferred_element_type=f32)

    nid = nid_ref[...]                                     # [N, 1] i32

    # ---- TemporalMessagePassingLayer: this tile of unique edges ------------
    @pl.when(k * TU < n_unique)                            # skip fully-padded tiles
    def _mp():
        col_u = colu_ref[...]                              # [1, TU] i32
        row_u = rowu_ref[...]                              # [1, TU] i32
        gmask = (nid == col_u).astype(f32)                 # [N, TU] gather one-hot
        smask = (nid == row_u).astype(f32)                 # [N, TU] scatter one-hot
        gathered = lax.dot_general(gmask, zw_t_ref[...], dn0,
                                   preferred_element_type=f32)        # [TU, H]
        tenc = lax.dot_general(tfT_ref[...], w_tmp_ref[...], dn0,
                               preferred_element_type=f32)            # [TU, H]
        msgs = gathered + tenc + b_mp_ref[...]                          # [TU, H]
        acc_mp_ref[...] += jnp.dot(smask, msgs, preferred_element_type=f32)

    # ---- StructuralFeatureLayer: this tile of edges -------------------------
    @pl.when(k * TS < n_edges)                             # skip fully-padded tiles
    def _sf():
        col = col_ref[...]                                 # [1, TS] i32
        row = row_ref[...]                                 # [1, TS] i32
        td = td_ref[...]                                   # [1, TS] f32
        gmask = (nid == col).astype(f32)                   # [N, TS]
        wsmask = (nid == row).astype(f32) * td             # [N, TS] td-weighted scatter
        gathered = lax.dot_general(gmask, zw_n_ref[...], dn0,
                                   preferred_element_type=f32)        # [TS, H+1]
        neigh = gathered + b_n_aug_ref[...]                # [TS, H+1], last col == 1
        # single scatter yields both segsum(neigh*td) (cols :H) and segsum(td) (col H)
        acc_sf_ref[...] += jnp.dot(wsmask, neigh, preferred_element_type=f32)

    # ---- finalize: per-node math + FeatureFusionLayer -----------------------
    @pl.when(k == pl.num_programs(0) - 1)
    def _finalize():
        z0 = z_ref[...]
        self_both = (jnp.dot(z0, w_s_both_ref[...], preferred_element_type=f32)
                     + b_s_both_ref[...])                  # [N, 2H]
        r_u = jnp.maximum(self_both[:, :H] + acc_mp_ref[...], 0.0)

        agg = acc_sf_ref[...]                              # [N, H+1]
        td_sum = agg[:, H:H + 1]                           # [N, 1]
        td_sum = jnp.where(td_sum == 0.0, 1.0, td_sum)     # matches torch ==0 -> 1
        gamma_u = jnp.maximum(self_both[:, H:] + agg[:, :H] / td_sum, 0.0)

        # cat([r_u, gamma_u], 1) @ W1 == r_u @ W1a + gamma_u @ W1b  (runs once)
        h1 = (jnp.dot(r_u, w_f1a_ref[...], preferred_element_type=f32)
              + jnp.dot(gamma_u, w_f1b_ref[...], preferred_element_type=f32)
              + b_f1_ref[...])
        h1 = jnp.maximum(h1, 0.0)
        h2 = jnp.dot(h1, w_f2_ref[...], preferred_element_type=f32) + b_f2_ref[...]
        out_ref[...] = z0 + jnp.maximum(h2, 0.0)


# ----------------------------------------------------------------------------
# Wrapper
# ----------------------------------------------------------------------------
def _vmem_padded_bytes(shape, itemsize=4):
    """Bytes a buffer occupies in VMEM after (8,128) tile padding."""
    if len(shape) == 1:
        lead, sub, lane = 1, 1, int(shape[0])
    else:
        lead = 1
        for d in shape[:-2]:
            lead *= int(d)
        sub, lane = int(shape[-2]), int(shape[-1])
    return lead * (-(-sub // 8) * 8) * (-(-lane // 128) * 128) * itemsize


@jax.jit
def layerset_forward(params, z, edge_index, temporal_features, time_diffs, unique_edges):
    f32 = jnp.float32
    N, Cin = z.shape
    H = params["w_s_mp"].shape[1]
    T = temporal_features.shape[1]
    E = edge_index.shape[1]
    Eu = unique_edges.shape[1]

    num_tiles = max(pl.cdiv(E, EDGE_TILE), pl.cdiv(Eu, EDGE_TILE))
    Ep = num_tiles * EDGE_TILE

    # Edge indices are assumed to lie in [0, N); the padding value N matches no
    # node in the in-kernel comparison, so padded edges contribute nothing.
    pad = jnp.int32(N)
    row = edge_index[0].astype(jnp.int32)
    col = edge_index[1].astype(jnp.int32)
    row_u = unique_edges[0].astype(jnp.int32)
    col_u = unique_edges[1].astype(jnp.int32)

    col_p = jnp.full((1, Ep), pad, jnp.int32).at[0, :E].set(col)
    row_p = jnp.full((1, Ep), pad, jnp.int32).at[0, :E].set(row)
    colu_p = jnp.full((1, Ep), pad, jnp.int32).at[0, :Eu].set(col_u)
    rowu_p = jnp.full((1, Ep), pad, jnp.int32).at[0, :Eu].set(row_u)
    td_p = jnp.zeros((1, Ep), f32).at[0, :E].set(time_diffs.astype(f32))
    tfT_p = jnp.zeros((T, Ep), f32).at[:, :Eu].set(temporal_features.astype(f32).T)

    # Stacked / augmented weights (built once per call; trivially cheap).
    w_t_mp = params["w_t_mp"].astype(f32)
    w_tmp = params["w_tmp"].astype(f32)
    b_mp = (params["b_t_mp"] + params["b_tmp"]).astype(f32)
    w_n_aug = jnp.concatenate([params["w_n_sf"].astype(f32),
                               jnp.zeros((Cin, 1), f32)], axis=1)
    b_n_aug = jnp.concatenate([params["b_n_sf"].astype(f32),
                               jnp.ones((1, 1), f32)], axis=1)
    w_s_both = jnp.concatenate([params["w_s_mp"].astype(f32),
                                params["w_s_sf"].astype(f32)], axis=1)
    b_s_both = jnp.concatenate([params["b_s_mp"].astype(f32),
                                params["b_s_sf"].astype(f32)], axis=1)

    z32 = z.astype(f32)
    inputs = (z32, colu_p, rowu_p, tfT_p, col_p, row_p, td_p,
              w_t_mp, w_tmp, b_mp, w_n_aug, b_n_aug, w_s_both, b_s_both,
              params["w_f1a"].astype(f32), params["w_f1b"].astype(f32),
              params["b_f1"].astype(f32),
              params["w_f2"].astype(f32), params["b_f2"].astype(f32))

    res = lambda arr: pl.BlockSpec(arr.shape, lambda k: (0,) * arr.ndim)  # resident
    edge_row = lambda: pl.BlockSpec((1, EDGE_TILE), lambda k: (0, k))

    in_specs = [
        res(z32),
        edge_row(), edge_row(),                               # col_u, row_u
        pl.BlockSpec((T, EDGE_TILE), lambda k: (0, k)),       # temporal features^T
        edge_row(), edge_row(), edge_row(),                   # col, row, td
    ] + [res(p) for p in inputs[7:]]

    scratch_shapes = [
        pltpu.VMEM((N, H), f32),         # message-passing accumulator
        pltpu.VMEM((N, H + 1), f32),     # structural accumulator (+ td-sum col)
        pltpu.VMEM((N, H), f32),         # z @ W_T
        pltpu.VMEM((N, H + 1), f32),     # z @ W_N_aug
        pltpu.VMEM((N, 1), jnp.int32),   # node ids
    ]

    # --- scoped-VMEM budget from actual (tile-padded) buffer sizes -----------
    tiled = [(1, EDGE_TILE)] * 5 + [(T, EDGE_TILE)]
    resident = [tuple(p.shape) for p in inputs[7:]] + [(N, Cin), (N, Cin)]
    scratch = [(N, H), (N, H + 1), (N, H), (N, H + 1), (N, 1)]
    work = ([(N, EDGE_TILE)] * 4 + [(EDGE_TILE, H + 1)] * 2
            + [(EDGE_TILE, H)] * 2 + [(N, 2 * H)])
    vmem_need = (2 * sum(_vmem_padded_bytes(s) for s in tiled)     # double-buffered
                 + sum(_vmem_padded_bytes(s) for s in resident)
                 + sum(_vmem_padded_bytes(s) for s in scratch)
                 + sum(_vmem_padded_bytes(s) for s in work))
    # cap at 48 MiB so the request is safe on v7x's 64 MiB physical VMEM
    vmem_limit = int(min(max(4 * vmem_need, 32 << 20), 48 << 20))

    # --- advisory cost estimate ----------------------------------------------
    flops = (2 * num_tiles * EDGE_TILE * (N * (2 * H + 1) + T * H + N * (H + 1))
             + 2 * N * Cin * (2 * H + (H + 1) + 2 * H)
             + 2 * N * (2 * H * Cin + Cin * Cin))
    bytes_accessed = 4 * (2 * N * Cin + Ep * (5 + T)
                          + sum(int(p.size) for p in inputs[7:]))
    cost = pl.CostEstimate(flops=flops, transcendentals=0,
                           bytes_accessed=bytes_accessed)

    grid_spec = pltpu.PrefetchScalarGridSpec(
        num_scalar_prefetch=0,
        grid=(num_tiles,),
        in_specs=in_specs,
        out_specs=res(z32),
        scratch_shapes=scratch_shapes,
    )

    kernel = functools.partial(_layerset_kernel, E, Eu, H)
    return pl.pallas_call(
        kernel,
        out_shape=jax.ShapeDtypeStruct((N, Cin), f32),
        grid_spec=grid_spec,
        compiler_params=pltpu.CompilerParams(
            dimension_semantics=("arbitrary",),
            vmem_limit_bytes=vmem_limit),
        cost_estimate=cost,
    )(*inputs)


# ----------------------------------------------------------------------------
# Pure-JAX reference (mirrors the PyTorch module semantics) for verification.
# ----------------------------------------------------------------------------
def layerset_reference(params, z, edge_index, temporal_features, time_diffs, unique_edges):
    N = z.shape[0]
    row, col = edge_index[0], edge_index[1]
    row_u, col_u = unique_edges[0], unique_edges[1]

    # TemporalMessagePassingLayer
    self_mp = z @ params["w_s_mp"] + params["b_s_mp"]
    neigh_mp = z[col_u] @ params["w_t_mp"] + params["b_t_mp"]
    temp_enc = temporal_features @ params["w_tmp"] + params["b_tmp"]
    messages = neigh_mp + temp_enc
    agg_mp = jax.ops.segment_sum(messages, row_u, num_segments=N)
    r_u = jax.nn.relu(self_mp + agg_mp)

    # StructuralFeatureLayer
    self_sf = z @ params["w_s_sf"] + params["b_s_sf"]
    neigh_sf = z[col] @ params["w_n_sf"] + params["b_n_sf"]
    td = time_diffs.astype(jnp.float32)
    td_sum = jax.ops.segment_sum(td, row, num_segments=N)
    td_sum = jnp.where(td_sum == 0.0, 1.0, td_sum)
    rel_w = td / td_sum[row]
    agg_sf = jax.ops.segment_sum(neigh_sf * rel_w[:, None], row, num_segments=N)
    gamma_u = jax.nn.relu(self_sf + agg_sf)

    # FeatureFusionLayer
    h1 = jax.nn.relu(r_u @ params["w_f1a"] + gamma_u @ params["w_f1b"] + params["b_f1"])
    h2 = h1 @ params["w_f2"] + params["b_f2"]
    return z + jax.nn.relu(h2)


def init_params(key, in_channels, hidden_channels, temporal_dim):
    ks = jax.random.split(key, 14)
    s = 0.1

    def w(k, shape):
        return (s * jax.random.normal(k, shape)).astype(jnp.float32)

    return {
        "w_s_mp": w(ks[0], (in_channels, hidden_channels)),
        "b_s_mp": w(ks[1], (1, hidden_channels)),
        "w_t_mp": w(ks[2], (in_channels, hidden_channels)),
        "b_t_mp": w(ks[3], (1, hidden_channels)),
        "w_tmp": w(ks[4], (temporal_dim, hidden_channels)),
        "b_tmp": w(ks[5], (1, hidden_channels)),
        "w_s_sf": w(ks[6], (in_channels, hidden_channels)),
        "b_s_sf": w(ks[7], (1, hidden_channels)),
        "w_n_sf": w(ks[8], (in_channels, hidden_channels)),
        "b_n_sf": w(ks[9], (1, hidden_channels)),
        # fusion lin1 (2*hidden -> in_channels), split into r_u / gamma_u halves
        "w_f1a": w(ks[10], (hidden_channels, in_channels)),
        "w_f1b": w(ks[11], (hidden_channels, in_channels)),
        "b_f1": w(ks[12], (1, in_channels)),
        "w_f2": w(ks[13], (in_channels, in_channels)),
        "b_f2": jnp.zeros((1, in_channels), jnp.float32),
    }


if __name__ == "__main__":
    in_channels, hidden_channels, temporal_dim = 16, 32, 8
    N, E, Eu = 8, 16, 12

    key = jax.random.PRNGKey(0)
    k_p, k_z, k_e, k_ue, k_tf, k_td = jax.random.split(key, 6)

    params = init_params(k_p, in_channels, hidden_channels, temporal_dim)
    z = jax.random.normal(k_z, (N, in_channels), dtype=jnp.float32)
    edge_index = jax.random.randint(k_e, (2, E), 0, N, dtype=jnp.int32)
    unique_edges = jax.random.randint(k_ue, (2, Eu), 0, N, dtype=jnp.int32)
    temporal_features = jax.random.normal(k_tf, (Eu, temporal_dim), dtype=jnp.float32)
    time_diffs = jax.random.uniform(k_td, (E,), minval=0.0, maxval=5.0, dtype=jnp.float32)

    out = layerset_forward(params, z, edge_index, temporal_features, time_diffs, unique_edges)
    out = jax.block_until_ready(out)

    ref = layerset_reference(params, z, edge_index, temporal_features, time_diffs, unique_edges)
    assert out.shape == (N, in_channels)
    assert jnp.allclose(out, ref, atol=1e-4, rtol=1e-4), float(jnp.max(jnp.abs(out - ref)))

    print("KERNEL_OK")
</pallas_src>

<mosaic_0001>
module attributes {stable_mosaic.version = 11 : i64} {
  func.func @_layerset_kernel(%arg0: i32, %arg1: memref<8x16xf32, #tpu.memory_space<vmem>>, %arg2: memref<1x256xi32, #tpu.memory_space<vmem>>, %arg3: memref<1x256xi32, #tpu.memory_space<vmem>>, %arg4: memref<8x256xf32, #tpu.memory_space<vmem>>, %arg5: memref<1x256xi32, #tpu.memory_space<vmem>>, %arg6: memref<1x256xi32, #tpu.memory_space<vmem>>, %arg7: memref<1x256xf32, #tpu.memory_space<vmem>>, %arg8: memref<16x32xf32, #tpu.memory_space<vmem>>, %arg9: memref<8x32xf32, #tpu.memory_space<vmem>>, %arg10: memref<1x32xf32, #tpu.memory_space<vmem>>, %arg11: memref<16x33xf32, #tpu.memory_space<vmem>>, %arg12: memref<1x33xf32, #tpu.memory_space<vmem>>, %arg13: memref<16x64xf32, #tpu.memory_space<vmem>>, %arg14: memref<1x64xf32, #tpu.memory_space<vmem>>, %arg15: memref<32x16xf32, #tpu.memory_space<vmem>>, %arg16: memref<32x16xf32, #tpu.memory_space<vmem>>, %arg17: memref<1x16xf32, #tpu.memory_space<vmem>>, %arg18: memref<16x16xf32, #tpu.memory_space<vmem>>, %arg19: memref<1x16xf32, #tpu.memory_space<vmem>>, %arg20: memref<8x16xf32, #tpu.memory_space<vmem>>, %arg21: memref<8x32xf32, #tpu.memory_space<vmem>>, %arg22: memref<8x33xf32, #tpu.memory_space<vmem>>, %arg23: memref<8x32xf32, #tpu.memory_space<vmem>>, %arg24: memref<8x33xf32, #tpu.memory_space<vmem>>, %arg25: memref<8x1xi32, #tpu.memory_space<vmem>>) attributes {dimension_semantics = [#tpu.dimension_semantics<arbitrary>], iteration_bounds = array<i64: 1>, scalar_prefetch = 0 : i64, scratch_operands = 5 : i64, tpu.core_type = #tpu.core_type<tc>, window_params = [{pipeline_mode = #tpu.pipeline_mode<synchronous>, transform_indices = @transform_0, window_bounds = array<i64: 8, 16>}, {transform_indices = @transform_1, window_bounds = array<i64: 1, 256>}, {transform_indices = @transform_2, window_bounds = array<i64: 1, 256>}, {transform_indices = @transform_3, window_bounds = array<i64: 8, 256>}, {transform_indices = @transform_4, window_bounds = array<i64: 1, 256>}, {transform_indices = @transform_5, window_bounds = array<i64: 1, 256>}, {transform_indices = @transform_6, window_bounds = array<i64: 1, 256>}, {pipeline_mode = #tpu.pipeline_mode<synchronous>, transform_indices = @transform_7, window_bounds = array<i64: 16, 32>}, {pipeline_mode = #tpu.pipeline_mode<synchronous>, transform_indices = @transform_8, window_bounds = array<i64: 8, 32>}, {pipeline_mode = #tpu.pipeline_mode<synchronous>, transform_indices = @transform_9, window_bounds = array<i64: 1, 32>}, {pipeline_mode = #tpu.pipeline_mode<synchronous>, transform_indices = @transform_10, window_bounds = array<i64: 16, 33>}, {pipeline_mode = #tpu.pipeline_mode<synchronous>, transform_indices = @transform_11, window_bounds = array<i64: 1, 33>}, {pipeline_mode = #tpu.pipeline_mode<synchronous>, transform_indices = @transform_12, window_bounds = array<i64: 16, 64>}, {pipeline_mode = #tpu.pipeline_mode<synchronous>, transform_indices = @transform_13, window_bounds = array<i64: 1, 64>}, {pipeline_mode = #tpu.pipeline_mode<synchronous>, transform_indices = @transform_14, window_bounds = array<i64: 32, 16>}, {pipeline_mode = #tpu.pipeline_mode<synchronous>, transform_indices = @transform_15, window_bounds = array<i64: 32, 16>}, {pipeline_mode = #tpu.pipeline_mode<synchronous>, transform_indices = @transform_16, window_bounds = array<i64: 1, 16>}, {pipeline_mode = #tpu.pipeline_mode<synchronous>, transform_indices = @transform_17, window_bounds = array<i64: 16, 16>}, {pipeline_mode = #tpu.pipeline_mode<synchronous>, transform_indices = @transform_18, window_bounds = array<i64: 1, 16>}, {pipeline_mode = #tpu.pipeline_mode<synchronous>, transform_indices = @transform_19, window_bounds = array<i64: 8, 16>}]} {
    %c0_i32 = arith.constant 0 : i32
    %0 = arith.cmpi eq, %arg0, %c0_i32 : i32
    %1 = arith.extui %0 : i1 to i32
    %c0_i32_0 = arith.constant 0 : i32
    %2 = arith.cmpi ne, %1, %c0_i32_0 : i32
    scf.if %2 {
      %cst = arith.constant 0.000000e+00 : f32
      %15 = vector.broadcast %cst : f32 to vector<8x32xf32>
      %c0_7 = arith.constant 0 : index
      %c0_8 = arith.constant 0 : index
      %16 = vector.load %arg21[%c0_7, %c0_8] : memref<8x32xf32, #tpu.memory_space<vmem>>, vector<8x32xf32>
      tpu.vector_store %arg21[%c0_7, %c0_8], %15 {strides = array<i32>} : memref<8x32xf32, #tpu.memory_space<vmem>>, vector<8x32xf32>,
      %cst_9 = arith.constant 0.000000e+00 : f32
      %17 = vector.broadcast %cst_9 : f32 to vector<8x33xf32>
      %c0_10 = arith.constant 0 : index
      %c0_11 = arith.constant 0 : index
      %18 = vector.load %arg22[%c0_10, %c0_11] : memref<8x33xf32, #tpu.memory_space<vmem>>, vector<8x33xf32>
      tpu.vector_store %arg22[%c0_10, %c0_11], %17 {strides = array<i32>} : memref<8x33xf32, #tpu.memory_space<vmem>>, vector<8x33xf32>,
      %19 = tpu.iota {dimensions = array<i32: 0>} : vector<8x1xi32>
      %c0_12 = arith.constant 0 : index
      %c0_13 = arith.constant 0 : index
      %20 = vector.load %arg25[%c0_12, %c0_13] : memref<8x1xi32, #tpu.memory_space<vmem>>, vector<8x1xi32>
      tpu.vector_store %arg25[%c0_12, %c0_13], %19 {strides = array<i32>} : memref<8x1xi32, #tpu.memory_space<vmem>>, vector<8x1xi32>,
      %c0_14 = arith.constant 0 : index
      %c0_15 = arith.constant 0 : index
      %21 = vector.load %arg1[%c0_14, %c0_15] : memref<8x16xf32, #tpu.memory_space<vmem>>, vector<8x16xf32>
      %c0_16 = arith.constant 0 : index
      %c0_17 = arith.constant 0 : index
      %22 = vector.load %arg8[%c0_16, %c0_17] : memref<16x32xf32, #tpu.memory_space<vmem>>, vector<16x32xf32>
      %cst_18 = arith.constant dense<0.000000e+00> : vector<8x32xf32>
      %23 = tpu.matmul %21, %22, %cst_18 {dimension_numbers = #tpu.dot_dimension_numbers<[1], [0], [0], [1], [0, 0, 1, 1], [], []>} : vector<8x16xf32>, vector<16x32xf32>, vector<8x32xf32> -> vector<8x32xf32>
      %c0_19 = arith.constant 0 : index
      %c0_20 = arith.constant 0 : index
      %24 = vector.load %arg23[%c0_19, %c0_20] : memref<8x32xf32, #tpu.memory_space<vmem>>, vector<8x32xf32>
      tpu.vector_store %arg23[%c0_19, %c0_20], %23 {strides = array<i32>} : memref<8x32xf32, #tpu.memory_space<vmem>>, vector<8x32xf32>,
      %c0_21 = arith.constant 0 : index
      %c0_22 = arith.constant 0 : index
      %25 = vector.load %arg11[%c0_21, %c0_22] : memref<16x33xf32, #tpu.memory_space<vmem>>, vector<16x33xf32>
      %cst_23 = arith.constant dense<0.000000e+00> : vector<8x33xf32>
      %26 = tpu.matmul %21, %25, %cst_23 {dimension_numbers = #tpu.dot_dimension_numbers<[1], [0], [0], [1], [0, 0, 1, 1], [], []>} : vector<8x16xf32>, vector<16x33xf32>, vector<8x33xf32> -> vector<8x33xf32>
      %c0_24 = arith.constant 0 : index
      %c0_25 = arith.constant 0 : index
      %27 = vector.load %arg24[%c0_24, %c0_25] : memref<8x33xf32, #tpu.memory_space<vmem>>, vector<8x33xf32>
      tpu.vector_store %arg24[%c0_24, %c0_25], %26 {strides = array<i32>} : memref<8x33xf32, #tpu.memory_space<vmem>>, vector<8x33xf32>,
    } else {
    }
    %c0 = arith.constant 0 : index
    %c0_1 = arith.constant 0 : index
    %3 = vector.load %arg25[%c0, %c0_1] : memref<8x1xi32, #tpu.memory_space<vmem>>, vector<8x1xi32>
    %c256_i32 = arith.constant 256 : i32
    %4 = arith.muli %arg0, %c256_i32 : i32
    %c12_i32 = arith.constant 12 : i32
    %5 = arith.cmpi slt, %4, %c12_i32 : i32
    %6 = arith.extui %5 : i1 to i32
    %c0_i32_2 = arith.constant 0 : i32
    %7 = arith.cmpi ne, %6, %c0_i32_2 : i32
    scf.if %7 {
      %c0_7 = arith.constant 0 : index
      %c0_8 = arith.constant 0 : index
      %15 = vector.load %arg2[%c0_7, %c0_8] : memref<1x256xi32, #tpu.memory_space<vmem>>, vector<1x256xi32>
      %c0_9 = arith.constant 0 : index
      %c0_10 = arith.constant 0 : index
      %16 = vector.load %arg3[%c0_9, %c0_10] : memref<1x256xi32, #tpu.memory_space<vmem>>, vector<1x256xi32>
      %17 = vector.broadcast %3 : vector<8x1xi32> to vector<8x256xi32>
      %18 = vector.broadcast %15 : vector<1x256xi32> to vector<8x256xi32>
      %19 = arith.cmpi eq, %17, %18 : vector<8x256xi32>
      %20 = arith.extui %19 : vector<8x256xi1> to vector<8x256xi32>
      %21 = arith.sitofp %20 : vector<8x256xi32> to vector<8x256xf32>
      %22 = vector.broadcast %3 : vector<8x1xi32> to vector<8x256xi32>
      %23 = vector.broadcast %16 : vector<1x256xi32> to vector<8x256xi32>
      %24 = arith.cmpi eq, %22, %23 : vector<8x256xi32>
      %25 = arith.extui %24 : vector<8x256xi1> to vector<8x256xi32>
      %26 = arith.sitofp %25 : vector<8x256xi32> to vector<8x256xf32>
      %c0_11 = arith.constant 0 : index
      %c0_12 = arith.constant 0 : index
      %27 = vector.load %arg23[%c0_11, %c0_12] : memref<8x32xf32, #tpu.memory_space<vmem>>, vector<8x32xf32>
      %cst = arith.constant dense<0.000000e+00> : vector<256x32xf32>
      %28 = tpu.matmul %21, %27, %cst {dimension_numbers = #tpu.dot_dimension_numbers<[0], [0], [1], [1], [0, 1, 1, 1], [], []>} : vector<8x256xf32>, vector<8x32xf32>, vector<256x32xf32> -> vector<256x32xf32>
      %c0_13 = arith.constant 0 : index
      %c0_14 = arith.constant 0 : index
      %29 = vector.load %arg4[%c0_13, %c0_14] : memref<8x256xf32, #tpu.memory_space<vmem>>, vector<8x256xf32>
      %c0_15 = arith.constant 0 : index
      %c0_16 = arith.constant 0 : index
      %30 = vector.load %arg9[%c0_15, %c0_16] : memref<8x32xf32, #tpu.memory_space<vmem>>, vector<8x32xf32>
      %cst_17 = arith.constant dense<0.000000e+00> : vector<256x32xf32>
      %31 = tpu.matmul %29, %30, %cst_17 {dimension_numbers = #tpu.dot_dimension_numbers<[0], [0], [1], [1], [0, 1, 1, 1], [], []>} : vector<8x256xf32>, vector<8x32xf32>, vector<256x32xf32> -> vector<256x32xf32>
      %32 = arith.addf %28, %31 : vector<256x32xf32>
      %c0_18 = arith.constant 0 : index
      %c0_19 = arith.constant 0 : index
      %33 = vector.load %arg10[%c0_18, %c0_19] : memref<1x32xf32, #tpu.memory_space<vmem>>, vector<1x32xf32>
      %34 = vector.broadcast %33 : vector<1x32xf32> to vector<256x32xf32>
      %35 = arith.addf %32, %34 : vector<256x32xf32>
      %c0_20 = arith.constant 0 : index
      %c0_21 = arith.constant 0 : index
      %36 = vector.load %arg21[%c0_20, %c0_21] : memref<8x32xf32, #tpu.memory_space<vmem>>, vector<8x32xf32>
      %cst_22 = arith.constant dense<0.000000e+00> : vector<8x32xf32>
      %37 = tpu.matmul %26, %35, %cst_22 {dimension_numbers = #tpu.dot_dimension_numbers<[1], [0], [0], [1], [0, 0, 1, 1], [], []>} : vector<8x256xf32>, vector<256x32xf32>, vector<8x32xf32> -> vector<8x32xf32>
      %38 = arith.addf %36, %37 : vector<8x32xf32>
      %c0_23 = arith.constant 0 : index
      %c0_24 = arith.constant 0 : index
      %39 = vector.load %arg21[%c0_23, %c0_24] : memref<8x32xf32, #tpu.memory_space<vmem>>, vector<8x32xf32>
      tpu.vector_store %arg21[%c0_23, %c0_24], %38 {strides = array<i32>} : memref<8x32xf32, #tpu.memory_space<vmem>>, vector<8x32xf32>,
    } else {
    }
    %c256_i32_3 = arith.constant 256 : i32
    %8 = arith.muli %arg0, %c256_i32_3 : i32
    %c16_i32 = arith.constant 16 : i32
    %9 = arith.cmpi slt, %8, %c16_i32 : i32
    %10 = arith.extui %9 : i1 to i32
    %c0_i32_4 = arith.constant 0 : i32
    %11 = arith.cmpi ne, %10, %c0_i32_4 : i32
    scf.if %11 {
      %c0_7 = arith.constant 0 : index
      %c0_8 = arith.constant 0 : index
      %15 = vector.load %arg5[%c0_7, %c0_8] : memref<1x256xi32, #tpu.memory_space<vmem>>, vector<1x256xi32>
      %c0_9 = arith.constant 0 : index
      %c0_10 = arith.constant 0 : index
      %16 = vector.load %arg6[%c0_9, %c0_10] : memref<1x256xi32, #tpu.memory_space<vmem>>, vector<1x256xi32>
      %c0_11 = arith.constant 0 : index
      %c0_12 = arith.constant 0 : index
      %17 = vector.load %arg7[%c0_11, %c0_12] : memref<1x256xf32, #tpu.memory_space<vmem>>, vector<1x256xf32>
      %18 = vector.broadcast %3 : vector<8x1xi32> to vector<8x256xi32>
      %19 = vector.broadcast %15 : vector<1x256xi32> to vector<8x256xi32>
      %20 = arith.cmpi eq, %18, %19 : vector<8x256xi32>
      %21 = arith.extui %20 : vector<8x256xi1> to vector<8x256xi32>
      %22 = arith.sitofp %21 : vector<8x256xi32> to vector<8x256xf32>
      %23 = vector.broadcast %3 : vector<8x1xi32> to vector<8x256xi32>
      %24 = vector.broadcast %16 : vector<1x256xi32> to vector<8x256xi32>
      %25 = arith.cmpi eq, %23, %24 : vector<8x256xi32>
      %26 = arith.extui %25 : vector<8x256xi1> to vector<8x256xi32>
      %27 = arith.sitofp %26 : vector<8x256xi32> to vector<8x256xf32>
      %28 = vector.broadcast %17 : vector<1x256xf32> to vector<8x256xf32>
      %29 = arith.mulf %27, %28 : vector<8x256xf32>
      %c0_13 = arith.constant 0 : index
      %c0_14 = arith.constant 0 : index
      %30 = vector.load %arg24[%c0_13, %c0_14] : memref<8x33xf32, #tpu.memory_space<vmem>>, vector<8x33xf32>
      %cst = arith.constant dense<0.000000e+00> : vector<256x33xf32>
      %31 = tpu.matmul %22, %30, %cst {dimension_numbers = #tpu.dot_dimension_numbers<[0], [0], [1], [1], [0, 1, 1, 1], [], []>} : vector<8x256xf32>, vector<8x33xf32>, vector<256x33xf32> -> vector<256x33xf32>
      %c0_15 = arith.constant 0 : index
      %c0_16 = arith.constant 0 : index
      %32 = vector.load %arg12[%c0_15, %c0_16] : memref<1x33xf32, #tpu.memory_space<vmem>>, vector<1x33xf32>
      %33 = vector.broadcast %32 : vector<1x33xf32> to vector<256x33xf32>
      %34 = arith.addf %31, %33 : vector<256x33xf32>
      %c0_17 = arith.constant 0 : index
      %c0_18 = arith.constant 0 : index
      %35 = vector.load %arg22[%c0_17, %c0_18] : memref<8x33xf32, #tpu.memory_space<vmem>>, vector<8x33xf32>
      %cst_19 = arith.constant dense<0.000000e+00> : vector<8x33xf32>
      %36 = tpu.matmul %29, %34, %cst_19 {dimension_numbers = #tpu.dot_dimension_numbers<[1], [0], [0], [1], [0, 0, 1, 1], [], []>} : vector<8x256xf32>, vector<256x33xf32>, vector<8x33xf32> -> vector<8x33xf32>
      %37 = arith.addf %35, %36 : vector<8x33xf32>
      %c0_20 = arith.constant 0 : index
      %c0_21 = arith.constant 0 : index
      %38 = vector.load %arg22[%c0_20, %c0_21] : memref<8x33xf32, #tpu.memory_space<vmem>>, vector<8x33xf32>
      tpu.vector_store %arg22[%c0_20, %c0_21], %37 {strides = array<i32>} : memref<8x33xf32, #tpu.memory_space<vmem>>, vector<8x33xf32>,
    } else {
    }
    %c0_i32_5 = arith.constant 0 : i32
    %12 = arith.cmpi eq, %arg0, %c0_i32_5 : i32
    %13 = arith.extui %12 : i1 to i32
    %c0_i32_6 = arith.constant 0 : i32
    %14 = arith.cmpi ne, %13, %c0_i32_6 : i32
    scf.if %14 {
      %c0_7 = arith.constant 0 : index
      %c0_8 = arith.constant 0 : index
      %15 = vector.load %arg1[%c0_7, %c0_8] : memref<8x16xf32, #tpu.memory_space<vmem>>, vector<8x16xf32>
      %c0_9 = arith.constant 0 : index
      %c0_10 = arith.constant 0 : index
      %16 = vector.load %arg13[%c0_9, %c0_10] : memref<16x64xf32, #tpu.memory_space<vmem>>, vector<16x64xf32>
      %cst = arith.constant dense<0.000000e+00> : vector<8x64xf32>
      %17 = tpu.matmul %15, %16, %cst {dimension_numbers = #tpu.dot_dimension_numbers<[1], [0], [0], [1], [0, 0, 1, 1], [], []>} : vector<8x16xf32>, vector<16x64xf32>, vector<8x64xf32> -> vector<8x64xf32>
      %c0_11 = arith.constant 0 : index
      %c0_12 = arith.constant 0 : index
      %18 = vector.load %arg14[%c0_11, %c0_12] : memref<1x64xf32, #tpu.memory_space<vmem>>, vector<1x64xf32>
      %19 = vector.broadcast %18 : vector<1x64xf32> to vector<8x64xf32>
      %20 = arith.addf %17, %19 : vector<8x64xf32>
      %21 = vector.extract_strided_slice %20 {offsets = [0, 0], sizes = [8, 32], strides = [1, 1]} : vector<8x64xf32> to vector<8x32xf32>
      %c0_13 = arith.constant 0 : index
      %c0_14 = arith.constant 0 : index
      %22 = vector.load %arg21[%c0_13, %c0_14] : memref<8x32xf32, #tpu.memory_space<vmem>>, vector<8x32xf32>
      %23 = arith.addf %21, %22 : vector<8x32xf32>
      %cst_15 = arith.constant 0.000000e+00 : f32
      %24 = vector.broadcast %cst_15 : f32 to vector<8x32xf32>
      %25 = arith.maximumf %23, %24 : vector<8x32xf32>
      %c0_16 = arith.constant 0 : index
      %c0_17 = arith.constant 0 : index
      %26 = vector.load %arg22[%c0_16, %c0_17] : memref<8x33xf32, #tpu.memory_space<vmem>>, vector<8x33xf32>
      %27 = vector.extract_strided_slice %26 {offsets = [0, 32], sizes = [8, 1], strides = [1, 1]} : vector<8x33xf32> to vector<8x1xf32>
      %cst_18 = arith.constant 0.000000e+00 : f32
      %28 = vector.broadcast %cst_18 : f32 to vector<8x1xf32>
      %29 = arith.cmpf oeq, %27, %28 : vector<8x1xf32>
      %cst_19 = arith.constant 1.000000e+00 : f32
      %30 = vector.broadcast %cst_19 : f32 to vector<8x1xf32>
      %31 = arith.select %29, %30, %27 : vector<8x1xi1>, vector<8x1xf32>
      %32 = vector.extract_strided_slice %20 {offsets = [0, 32], sizes = [8, 32], strides = [1, 1]} : vector<8x64xf32> to vector<8x32xf32>
      %33 = vector.extract_strided_slice %26 {offsets = [0, 0], sizes = [8, 32], strides = [1, 1]} : vector<8x33xf32> to vector<8x32xf32>
      %34 = vector.broadcast %31 : vector<8x1xf32> to vector<8x32xf32>
      %35 = arith.divf %33, %34 : vector<8x32xf32>
      %36 = arith.addf %32, %35 : vector<8x32xf32>
      %cst_20 = arith.constant 0.000000e+00 : f32
      %37 = vector.broadcast %cst_20 : f32 to vector<8x32xf32>
      %38 = arith.maximumf %36, %37 : vector<8x32xf32>
      %c0_21 = arith.constant 0 : index
      %c0_22 = arith.constant 0 : index
      %39 = vector.load %arg15[%c0_21, %c0_22] : memref<32x16xf32, #tpu.memory_space<vmem>>, vector<32x16xf32>
      %cst_23 = arith.constant dense<0.000000e+00> : vector<8x16xf32>
      %40 = tpu.matmul %25, %39, %cst_23 {dimension_numbers = #tpu.dot_dimension_numbers<[1], [0], [0], [1], [0, 0, 1, 1], [], []>} : vector<8x32xf32>, vector<32x16xf32>, vector<8x16xf32> -> vector<8x16xf32>
      %c0_24 = arith.constant 0 : index
      %c0_25 = arith.constant 0 : index
      %41 = vector.load %arg16[%c0_24, %c0_25] : memref<32x16xf32, #tpu.memory_space<vmem>>, vector<32x16xf32>
      %cst_26 = arith.constant dense<0.000000e+00> : vector<8x16xf32>
      %42 = tpu.matmul %38, %41, %cst_26 {dimension_numbers = #tpu.dot_dimension_numbers<[1], [0], [0], [1], [0, 0, 1, 1], [], []>} : vector<8x32xf32>, vector<32x16xf32>, vector<8x16xf32> -> vector<8x16xf32>
      %43 = arith.addf %40, %42 : vector<8x16xf32>
      %c0_27 = arith.constant 0 : index
      %c0_28 = arith.constant 0 : index
      %44 = vector.load %arg17[%c0_27, %c0_28] : memref<1x16xf32, #tpu.memory_space<vmem>>, vector<1x16xf32>
      %45 = vector.broadcast %44 : vector<1x16xf32> to vector<8x16xf32>
      %46 = arith.addf %43, %45 : vector<8x16xf32>
      %cst_29 = arith.constant 0.000000e+00 : f32
      %47 = vector.broadcast %cst_29 : f32 to vector<8x16xf32>
      %48 = arith.maximumf %46, %47 : vector<8x16xf32>
      %c0_30 = arith.constant 0 : index
      %c0_31 = arith.constant 0 : index
      %49 = vector.load %arg18[%c0_30, %c0_31] : memref<16x16xf32, #tpu.memory_space<vmem>>, vector<16x16xf32>
      %cst_32 = arith.constant dense<0.000000e+00> : vector<8x16xf32>
      %50 = tpu.matmul %48, %49, %cst_32 {dimension_numbers = #tpu.dot_dimension_numbers<[1], [0], [0], [1], [0, 0, 1, 1], [], []>} : vector<8x16xf32>, vector<16x16xf32>, vector<8x16xf32> -> vector<8x16xf32>
      %c0_33 = arith.constant 0 : index
      %c0_34 = arith.constant 0 : index
      %51 = vector.load %arg19[%c0_33, %c0_34] : memref<1x16xf32, #tpu.memory_space<vmem>>, vector<1x16xf32>
      %52 = vector.broadcast %51 : vector<1x16xf32> to vector<8x16xf32>
      %53 = arith.addf %50, %52 : vector<8x16xf32>
      %cst_35 = arith.constant 0.000000e+00 : f32
      %54 = vector.broadcast %cst_35 : f32 to vector<8x16xf32>
      %55 = arith.maximumf %53, %54 : vector<8x16xf32>
      %56 = arith.addf %15, %55 : vector<8x16xf32>
      %c0_36 = arith.constant 0 : index
      %c0_37 = arith.constant 0 : index
      %57 = vector.load %arg20[%c0_36, %c0_37] : memref<8x16xf32, #tpu.memory_space<vmem>>, vector<8x16xf32>
      tpu.vector_store %arg20[%c0_36, %c0_37], %56 {strides = array<i32>} : memref<8x16xf32, #tpu.memory_space<vmem>>, vector<8x16xf32>,
    } else {
    }
    return
  }
  func.func @transform_0(%arg0: i32) -> (i32, i32) {
    %c0_i32 = arith.constant 0 : i32
    %c0_i32_0 = arith.constant 0 : i32
    %c0_i32_1 = arith.constant 0 : i32
    return %c0_i32, %c0_i32_0 : i32, i32
  }
  func.func @transform_1(%arg0: i32) -> (i32, i32) {
    %c0_i32 = arith.constant 0 : i32
    %c0_i32_0 = arith.constant 0 : i32
    return %c0_i32, %arg0 : i32, i32
  }
  func.func @transform_2(%arg0: i32) -> (i32, i32) {
    %c0_i32 = arith.constant 0 : i32
    %c0_i32_0 = arith.constant 0 : i32
    return %c0_i32, %arg0 : i32, i32
  }
  func.func @transform_3(%arg0: i32) -> (i32, i32) {
    %c0_i32 = arith.constant 0 : i32
    %c0_i32_0 = arith.constant 0 : i32
    return %c0_i32, %arg0 : i32, i32
  }
  func.func @transform_4(%arg0: i32) -> (i32, i32) {
    %c0_i32 = arith.constant 0 : i32
    %c0_i32_0 = arith.constant 0 : i32
    return %c0_i32, %arg0 : i32, i32
  }
  func.func @transform_5(%arg0: i32) -> (i32, i32) {
    %c0_i32 = arith.constant 0 : i32
    %c0_i32_0 = arith.constant 0 : i32
    return %c0_i32, %arg0 : i32, i32
  }
  func.func @transform_6(%arg0: i32) -> (i32, i32) {
    %c0_i32 = arith.constant 0 : i32
    %c0_i32_0 = arith.constant 0 : i32
    return %c0_i32, %arg0 : i32, i32
  }
  func.func @transform_7(%arg0: i32) -> (i32, i32) {
    %c0_i32 = arith.constant 0 : i32
    %c0_i32_0 = arith.constant 0 : i32
    %c0_i32_1 = arith.constant 0 : i32
    return %c0_i32, %c0_i32_0 : i32, i32
  }
  func.func @transform_8(%arg0: i32) -> (i32, i32) {
    %c0_i32 = arith.constant 0 : i32
    %c0_i32_0 = arith.constant 0 : i32
    %c0_i32_1 = arith.constant 0 : i32
    return %c0_i32, %c0_i32_0 : i32, i32
  }
  func.func @transform_9(%arg0: i32) -> (i32, i32) {
    %c0_i32 = arith.constant 0 : i32
    %c0_i32_0 = arith.constant 0 : i32
    %c0_i32_1 = arith.constant 0 : i32
    return %c0_i32, %c0_i32_0 : i32, i32
  }
  func.func @transform_10(%arg0: i32) -> (i32, i32) {
    %c0_i32 = arith.constant 0 : i32
    %c0_i32_0 = arith.constant 0 : i32
    %c0_i32_1 = arith.constant 0 : i32
    return %c0_i32, %c0_i32_0 : i32, i32
  }
  func.func @transform_11(%arg0: i32) -> (i32, i32) {
    %c0_i32 = arith.constant 0 : i32
    %c0_i32_0 = arith.constant 0 : i32
    %c0_i32_1 = arith.constant 0 : i32
    return %c0_i32, %c0_i32_0 : i32, i32
  }
  func.func @transform_12(%arg0: i32) -> (i32, i32) {
    %c0_i32 = arith.constant 0 : i32
    %c0_i32_0 = arith.constant 0 : i32
    %c0_i32_1 = arith.constant 0 : i32
    return %c0_i32, %c0_i32_0 : i32, i32
  }
  func.func @transform_13(%arg0: i32) -> (i32, i32) {
    %c0_i32 = arith.constant 0 : i32
    %c0_i32_0 = arith.constant 0 : i32
    %c0_i32_1 = arith.constant 0 : i32
    return %c0_i32, %c0_i32_0 : i32, i32
  }
  func.func @transform_14(%arg0: i32) -> (i32, i32) {
    %c0_i32 = arith.constant 0 : i32
    %c0_i32_0 = arith.constant 0 : i32
    %c0_i32_1 = arith.constant 0 : i32
    return %c0_i32, %c0_i32_0 : i32, i32
  }
  func.func @transform_15(%arg0: i32) -> (i32, i32) {
    %c0_i32 = arith.constant 0 : i32
    %c0_i32_0 = arith.constant 0 : i32
    %c0_i32_1 = arith.constant 0 : i32
    return %c0_i32, %c0_i32_0 : i32, i32
  }
  func.func @transform_16(%arg0: i32) -> (i32, i32) {
    %c0_i32 = arith.constant 0 : i32
    %c0_i32_0 = arith.constant 0 : i32
    %c0_i32_1 = arith.constant 0 : i32
    return %c0_i32, %c0_i32_0 : i32, i32
  }
  func.func @transform_17(%arg0: i32) -> (i32, i32) {
    %c0_i32 = arith.constant 0 : i32
    %c0_i32_0 = arith.constant 0 : i32
    %c0_i32_1 = arith.constant 0 : i32
    return %c0_i32, %c0_i32_0 : i32, i32
  }
  func.func @transform_18(%arg0: i32) -> (i32, i32) {
    %c0_i32 = arith.constant 0 : i32
    %c0_i32_0 = arith.constant 0 : i32
    %c0_i32_1 = arith.constant 0 : i32
    return %c0_i32, %c0_i32_0 : i32, i32
  }
  func.func @transform_19(%arg0: i32) -> (i32, i32) {
    %c0_i32 = arith.constant 0 : i32
    %c0_i32_0 = arith.constant 0 : i32
    %c0_i32_1 = arith.constant 0 : i32
    return %c0_i32, %c0_i32_0 : i32, i32
  }
}

</mosaic_0001>

<bundles_post_ra>
// kernel: layerset_forward.1
= control target key start
LH: loop header
LB: loop body
LE: loop exit
PB: predicated region body
PF: predicated region fallthrough
CT: control target
= control target key end

     0   :  { %s3245_s0 = inlined_call_operand.vmem [shape: f32[8,16], index: 0, kind: input, shape index: {}]   ;;  %s3246_s1 = inlined_call_operand.vmem [shape: s32[1,256], index: 1, kind: input, shape index: {}]   ;;  %s3247_s2 = inlined_call_operand.vmem [shape: s32[1,256], index: 2, kind: input, shape index: {}]   ;;  %s3248_s3 = inlined_call_operand.vmem [shape: f32[8,256], index: 3, kind: input, shape index: {}]   ;;  %s3249_s4 = inlined_call_operand.vmem [shape: s32[1,256], index: 4, kind: input, shape index: {}]   ;;  %s3250_s5 = inlined_call_operand.vmem [shape: s32[1,256], index: 5, kind: input, shape index: {}]   ;;  %s3251_s6 = inlined_call_operand.vmem [shape: f32[1,256], index: 6, kind: input, shape index: {}]   ;;  %s3252_s7 = inlined_call_operand.vmem [shape: f32[16,32], index: 7, kind: input, shape index: {}]   ;;  %s3253_s8 = inlined_call_operand.vmem [shape: f32[8,32], index: 8, kind: input, shape index: {}]   ;;  %s3254_s9 = inlined_call_operand.vmem [shape: f32[1,32], index: 9, kind: input, shape index: {}]   ;;  %s3255_s10 = inlined_call_operand.vmem [shape: f32[16,33], index: 10, kind: input, shape index: {}]   ;;  %s3256_s11 = inlined_call_operand.vmem [shape: f32[1,33], index: 11, kind: input, shape index: {}]   ;;  %s3257_s12 = inlined_call_operand.vmem [shape: f32[16,64], index: 12, kind: input, shape index: {}]   ;;  %s3258_s13 = inlined_call_operand.vmem [shape: f32[1,64], index: 13, kind: input, shape index: {}]   ;;  %s3259_s14 = inlined_call_operand.vmem [shape: f32[32,16], index: 14, kind: input, shape index: {}]   ;;  %s3260_s15 = inlined_call_operand.vmem [shape: f32[32,16], index: 15, kind: input, shape index: {}]   ;;  %s3261_s16 = inlined_call_operand.vmem [shape: f32[1,16], index: 16, kind: input, shape index: {}]   ;;  %s3262_s17 = inlined_call_operand.vmem [shape: f32[16,16], index: 17, kind: input, shape index: {}]   ;;  %s3263_s18 = inlined_call_operand.vmem [shape: f32[1,16], index: 18, kind: input, shape index: {}]   ;;  %s3264_s19 = inlined_call_operand.hbm [shape: f32[8,16], index: 19, kind: output, shape index: {}]  }
   0x1   :  { %3267 = sst [smem:[#allocation10_spill]] %s3245_s0 }
   0x2   :  { %3268 = sst [smem:[#allocation11_spill]] %s3246_s1 }
   0x3   :  { %3269 = sst [smem:[#allocation12_spill]] %s3247_s2 }
   0x4   :  { %3270 = sst [smem:[#allocation13_spill]] %s3248_s3 }
   0x5   :  { %v71_v0 = vlaneseq  ;;  %v76_v1 = vld [vmem:[%s3252_s7] sm:$0xff]  ;;  %v77_v2 = vld [vmem:[%s3252_s7 + $0x8] sm:$0xff]  ;;  %v2710_v3 = vmov 0   ;;  %vm73_vm0 = vcmask 7168   ;;  %v2711_v4 = vmov 0.0|0.0   ;;  %s3271_s2 = sld [smem:[#allocation13_spill]] }
   0x6   :  { %2680 = vset.pattern.permute.xlu0 %v2710_v3  ;;  %2551 = vmatprep.subr.bf16.mxu0 %v2711_v4  ;;  %v2552_v5 = vpack.c.bf16 %v77_v2, %v76_v1  ;;  %v153_v7 = vld [vmem:[%s3255_s10] sm:$0xff]  ;;  %vm2712_vm1 = vmmov 0   ;;  %v2713_v9 = vmov 0.0   ;;  %v154_v10 = vld [vmem:[%s3255_s10 + $0x8] sm:$0xff] }
   0x7   :  { %v72_v8 = vshrl.u32 %v71_v0, 7  ;;  %2355 = vmatprep.mubr.msk.f32.mxu0 %vm2712_vm1, %v2713_v9 }
   0xb   :  { %v267_v6 = vld [vmem:[%s3271_s2 + $0x8] sm:$0xff] }
   0xc   :  { %301 = vxpose.xlu1.b32.start.end [1/1] (short) %v267_v6, 128 }
   0xd   :  { %24 = vsyncpa [#allocation8], 0  ;;  %2553 = vmatpush3.bf16.msra.mxu0 %v2552_v5  ;;  %s3272_s27 = sld [smem:[#allocation10_spill]]  ;;  %vm78_vm2 = vcmask 130048   ;;  %2554 = vmatprep.subr.bf16.mxu1 %v2711_v4  ;;  %v2555_v12 = vpack.c.bf16 %v154_v10, %v153_v7  ;;  %74 = vst.msk [vmem:[#allocation6] sm:$0xff] %vm73_vm0, %v72_v8  ;;  %v266_v14 = vld [vmem:[%s3271_s2] sm:$0xff] }
   0xe   :  { %2362 = vmatprep.mubr.msk.f32.mxu1 %vm2712_vm1, %v2713_v9  ;;  %v268_v15 = vld [vmem:[%s3253_s8] sm:$0xff]  ;;  %vm67_vm3 = vcmask 261120   ;;  %v2859_v16 = vsub.s32 0, %v72_v8  ;;  %v2861_v17 = vsub.s32 1, %v72_v8  ;;  %s3273_s21 = sld [smem:[#allocation12_spill]]  ;;  %s3274_s2 = sld [smem:[#allocation11_spill]] }
   0xf   :  { %2556 = vmatpush3.bf16.msra.mxu1 %v2555_v12  ;;  %2365 = vmatprep.subr.mxu0 %v268_v15  ;;  %68 = vst.msk [vmem:[#allocation2] sm:$0xff] %vm67_vm3, %v2713_v9  ;;  %v2714_v24 = vmov 1.0   ;;  %vm333_vm7 = vcmask 64512   ;;  %vm69_vm11 = vcmask 269312  }
  0x10   :  { %70 = vst.msk [vmem:[#allocation3] sm:$0xff] %vm69_vm11, %v2713_v9 }
  0x13   :  { %v2840_v11 = vld [vmem:[%s3272_s27] sm:$0xff] }
  0x14   :  { %2356 = vmatmul.mubr.msk.f32.vlgmr.msra.gmra.mrb[0].mxu0 %vm78_vm2, %v2840_v11  ;;  %2363 = vmatmul.mubr.msk.f32.vlgmr.msra.gmra.mrb[0].mxu1 %vm78_vm2, %v2840_v11  ;;  %v2850_v13 = vld [vmem:[#allocation6] sm:$0xff] }
  0x15   :  { %235 = vperm.xlu0 %2680, %v2850_v13   ;;  %2366 = vmatpush3.msra.mxu0 %v268_v15  ;;  %v2868_v18 = vld [vmem:[%s3273_s21] sm:$0x3] }
  0x16   :  { %v232_v19 = vld [vmem:[%s3274_s2] sm:$0x3]  ;;  %v258_v20 = vrot.slane %v2868_v18, %v2861_v17  ;;  %s2716_s2 = smov 32  }
  0x17   :  { %v244_v21 = vrot.slane %v232_v19, %v2861_v17  ;;  %v240_v22 = vrot.slane %v232_v19, %v2859_v16 }
  0x33   :  { %269 = vxpose.xlu0.b32.start.end [1/1] (short) %v266_v14, 128 }
  0x8c   :  { %v317_v27 = vpop.trf.xlu1 }
  0x90   :  { %v318_v30 = vpop.trf.xlu1 }
  0x94   :  { %v2877_v23 = vpop.permute.xlu0 %235  ;;  %v319_v32 = vpop.trf.xlu1 }
  0x95   :  { %vm260_vm4 = vcmp.eq.s32.totalorder %v2877_v23, %v258_v20  ;;  %vm246_vm5 = vcmp.eq.s32.totalorder %v2877_v23, %v244_v21  ;;  %vm245_vm6 = vcmp.eq.s32.totalorder %v2877_v23, %v240_v22 }
  0x96   :  { %2114 = vmatprep.mubr.msk.f32.mxu1 %vm260_vm4, %v2714_v24  ;;  %v2046_v25 = vsel %vm246_vm5, 1.0, %v2713_v9  ;;  %v2045_v26 = vsel %vm245_vm6, 1.0, %v2713_v9 }
  0x97   :  { %687 = vxpose.xlu0.b32.start.end [1/1] (short) %v2046_v25, 128  ;;  %655 = vxpose.xlu1.b32.start.end [1/1] (short) %v2045_v26, 128 }
  0x98   :  { %v320_v35 = vpop.trf.xlu1 }
  0x9c   :  { %v321_v37 = vpop.trf.xlu1 }
  0xa0   :  { %v322_v40 = vpop.trf.xlu1 }
  0xa4   :  { %v323_v42 = vpop.trf.xlu1 }
  0xa8   :  { %v324_v45 = vpop.trf.xlu1 }
  0xac   :  { %v325_v47 = vpop.trf.xlu1 }
  0xb0   :  { %v326_v52 = vpop.trf.xlu1 }
  0xb3   :  { %v285_v28 = vpop.trf.xlu0 }
  0xb4   :  { %2367 = vmatprep.mubr.msk.f32.mxu0 %vm333_vm7, %v285_v28  ;;  %v327_v56 = vpop.trf.xlu1 }
  0xb5   :  { %2681 = vset.pattern.permute.xlu1 %v2710_v3 }
  0xb7   :  { %v286_v29 = vpop.trf.xlu0 }
  0xb8   :  { %2368 = vmatmul.mubr.msk.f32.vlgmr.msra.gmra.mrb[2].mxu0 %vm333_vm7, %v286_v29  ;;  %v328_v57 = vpop.trf.xlu1 }
  0xbb   :  { %v287_v31 = vpop.trf.xlu0 }
  0xbc   :  { %2370 = vmatprep.mubr.msk.f32.mxu0 %vm333_vm7, %v287_v31  ;;  %v329_v58 = vpop.trf.xlu1 }
  0xbf   :  { %v288_v33 = vpop.trf.xlu0 }
  0xc0   :  { %2371 = vmatmul.mubr.msk.f32.gmra.mrb[4].mxu0 %vm333_vm7, %v288_v33  ;;  %v330_v59 = vpop.trf.xlu1 }
  0xc3   :  { %v289_v34 = vpop.trf.xlu0 }
  0xc4   :  { %2373 = vmatprep.mubr.msk.f32.mxu0 %vm333_vm7, %v289_v34  ;;  %v331_v60 = vpop.trf.xlu1 }
  0xc7   :  { %v290_v36 = vpop.trf.xlu0 }
  0xc8   :  { %2374 = vmatmul.mubr.msk.f32.gmra.mrb[6].mxu0 %vm333_vm7, %v290_v36  ;;  %v332_v61 = vpop.trf.xlu1  ;;  %v2949_v36 = vld [vmem:[%s3250_s5] sm:$0x3] }
  0xcb   :  { %v291_v38 = vpop.trf.xlu0 }
  0xcc   :  { %2376 = vmatprep.mubr.msk.f32.mxu0 %vm333_vm7, %v291_v38 }
  0xcf   :  { %v292_v39 = vpop.trf.xlu0 }
  0xd0   :  { %2377 = vmatmul.mubr.msk.f32.gmra.mrb[8].mxu0 %vm333_vm7, %v292_v39  ;;  %v2958_v39 = vld [vmem:[%s3251_s6] sm:$0x3] }
  0xd3   :  { %v293_v41 = vpop.trf.xlu0 }
  0xd4   :  { %2379 = vmatprep.mubr.msk.f32.mxu0 %vm333_vm7, %v293_v41 }
  0xd7   :  { %v294_v43 = vpop.trf.xlu0 }
  0xd8   :  { %2380 = vmatmul.mubr.msk.f32.gmra.mrb[10].mxu0 %vm333_vm7, %v294_v43  ;;  %v1195_v43 = vrot.slane %v2958_v39, %v2859_v16 }
  0xdb   :  { %v295_v44 = vpop.trf.xlu0 }
  0xdc   :  { %2382 = vmatprep.mubr.msk.f32.mxu0 %vm333_vm7, %v295_v44 }
  0xdf   :  { %v296_v46 = vpop.trf.xlu0 }
  0xe0   :  { %2383 = vmatmul.mubr.msk.f32.gmra.mrb[12].mxu0 %vm333_vm7, %v296_v46 }
  0xe3   :  { %v297_v49 = vpop.trf.xlu0 }
  0xe4   :  { %2385 = vmatprep.mubr.msk.f32.mxu0 %vm333_vm7, %v297_v49 }
  0xe7   :  { %v148_v48 = vpop.f32.mrb[0].mxu0  ;;  %v298_v51 = vpop.trf.xlu0 }
  0xe8   :  { %152 = vst.msk [vmem:[#allocation4] sm:$0xff] %vm67_vm3, %v148_v48  ;;  %v2357_v50 = vpop.f32.mrb[1].mxu0  ;;  %2386 = vmatmul.mubr.msk.f32.gmra.mrb[14].mxu0 %vm333_vm7, %v298_v51 }
  0xe9   :  { %v221_v50 = vpop.f32.mrb[0].mxu1 }
  0xea   :  { %225 = vst.msk [vmem:[#allocation5] sm:$0xff] %vm69_vm11, %v221_v50  ;;  %v2364_v51 = vpop.f32.mrb[1].mxu1 }
  0xeb   :  { %v299_v54 = vpop.trf.xlu0 }
  0xec   :  { %2388 = vmatprep.mubr.msk.f32.mxu0 %vm333_vm7, %v299_v54 }
  0xef   :  { %v265_v53 = vld [vmem:[#allocation4] sm:$0xff]  ;;  %v300_v55 = vpop.trf.xlu0 }
  0xf0   :  { %2415 = vmatprep.subr.mxu0 %v265_v53  ;;  %2389 = vmatmul.mubr.msk.f32.gmra.mrb[16].mxu0 %vm333_vm7, %v300_v55 }
  0xf1   :  { %2416 = vmatpush3.msra.mxu0 %v265_v53  ;;  %2391 = vmatprep.mubr.msk.f32.mxu0 %vm333_vm7, %v317_v27 }
  0xf2   :  { %1161 = vperm.xlu1 %2681, %v2850_v13  }
  0xf4   :  { %2392 = vmatmul.mubr.msk.f32.gmra.mrb[18].mxu0 %vm333_vm7, %v318_v30 }
  0xf5   :  { %2394 = vmatprep.mubr.msk.f32.mxu0 %vm333_vm7, %v319_v32 }
  0xf8   :  { %2395 = vmatmul.mubr.msk.f32.gmra.mrb[20].mxu0 %vm333_vm7, %v320_v35 }
  0xf9   :  { %2397 = vmatprep.mubr.msk.f32.mxu0 %vm333_vm7, %v321_v37  ;;  %v1157_v37 = vld [vmem:[%s3249_s4] sm:$0x3] }
  0xfa   :  { %v1170_v41 = vrot.slane %v1157_v37, %v2861_v17 }
  0xfc   :  { %2398 = vmatmul.mubr.msk.f32.gmra.mrb[22].mxu0 %vm333_vm7, %v322_v40  ;;  %v1180_v40 = vrot.slane %v2949_v36, %v2859_v16 }
  0xfd   :  { %2400 = vmatprep.mubr.msk.f32.mxu0 %vm333_vm7, %v323_v42  ;;  %v1166_v42 = vrot.slane %v1157_v37, %v2859_v16 }
 0x100   :  { %2401 = vmatmul.mubr.msk.f32.gmra.mrb[24].mxu0 %vm333_vm7, %v324_v45 }
 0x101   :  { %2403 = vmatprep.mubr.msk.f32.mxu0 %vm333_vm7, %v325_v47 }
 0x104   :  { %2404 = vmatmul.mubr.msk.f32.gmra.mrb[26].mxu0 %vm333_vm7, %v326_v52  ;;  %v2986_v52 = vld [vmem:[%s3254_s9] ss:$0 sm:$0xff] }
 0x105   :  { %2406 = vmatprep.mubr.msk.f32.mxu0 %vm333_vm7, %v327_v56 }
 0x108   :  { %2407 = vmatmul.mubr.msk.f32.gmra.mrb[28].mxu0 %vm333_vm7, %v328_v57 }
 0x109   :  { %2409 = vmatprep.mubr.msk.f32.mxu0 %vm333_vm7, %v329_v58 }
 0x10c   :  { %2410 = vmatmul.mubr.msk.f32.gmra.mrb[30].mxu0 %vm333_vm7, %v330_v59 }
 0x10d   :  { %2412 = vmatprep.mubr.msk.f32.mxu0 %vm333_vm7, %v331_v60 }
 0x110   :  { %2413 = vmatmul.mubr.msk.f32.gmra.mrb[32].mxu0 %vm333_vm7, %v332_v61 }
 0x117   :  { %v671_v62 = vpop.trf.xlu1  ;;  %v703_v63 = vpop.trf.xlu0 }
 0x118   :  { %2417 = vmatprep.mubr.msk.f32.mxu0 %vm333_vm7, %v671_v62 }
 0x11b   :  { %v672_v0 = vpop.trf.xlu1  ;;  %v704_v1 = vpop.trf.xlu0 }
 0x11c   :  { %2418 = vmatmul.mubr.msk.f32.vlgmr.msra.gmra.mrb[2].mxu0 %vm333_vm7, %v672_v0 }
 0x11f   :  { %v673_v2 = vpop.trf.xlu1  ;;  %v705_v5 = vpop.trf.xlu0 }
 0x120   :  { %2420 = vmatprep.mubr.msk.f32.mxu0 %vm333_vm7, %v673_v2 }
 0x123   :  { %v674_v3 = vpop.trf.xlu1  ;;  %v706_v7 = vpop.trf.xlu0 }
 0x124   :  { %2421 = vmatmul.mubr.msk.f32.gmra.mrb[4].mxu0 %vm333_vm7, %v674_v3 }
 0x127   :  { %v675_v6 = vpop.trf.xlu1  ;;  %v707_v12 = vpop.trf.xlu0 }
 0x128   :  { %2423 = vmatprep.mubr.msk.f32.mxu0 %vm333_vm7, %v675_v6 }
 0x12b   :  { %v676_v8 = vpop.trf.xlu1  ;;  %v708_v14 = vpop.trf.xlu0 }
 0x12c   :  { %2424 = vmatmul.mubr.msk.f32.gmra.mrb[6].mxu0 %vm333_vm7, %v676_v8 }
 0x12f   :  { %v677_v10 = vpop.trf.xlu1  ;;  %v709_v20 = vpop.trf.xlu0 }
 0x130   :  { %2426 = vmatprep.mubr.msk.f32.mxu0 %vm333_vm7, %v677_v10 }
 0x133   :  { %v678_v13 = vpop.trf.xlu1  ;;  %v710_v22 = vpop.trf.xlu0 }
 0x134   :  { %2427 = vmatmul.mubr.msk.f32.gmra.mrb[8].mxu0 %vm333_vm7, %v678_v13 }
 0x137   :  { %v679_v15 = vpop.trf.xlu1  ;;  %v711_v27 = vpop.trf.xlu0 }
 0x138   :  { %2429 = vmatprep.mubr.msk.f32.mxu0 %vm333_vm7, %v679_v15 }
 0x13b   :  { %v680_v19 = vpop.trf.xlu1  ;;  %v712_v29 = vpop.trf.xlu0 }
 0x13c   :  { %2430 = vmatmul.mubr.msk.f32.gmra.mrb[10].mxu0 %vm333_vm7, %v680_v19 }
 0x13f   :  { %v681_v21 = vpop.trf.xlu1  ;;  %v713_v32 = vpop.trf.xlu0 }
 0x140   :  { %2432 = vmatprep.mubr.msk.f32.mxu0 %vm333_vm7, %v681_v21 }
 0x143   :  { %v682_v25 = vpop.trf.xlu1  ;;  %v714_v33 = vpop.trf.xlu0 }
 0x144   :  { %2433 = vmatmul.mubr.msk.f32.gmra.mrb[12].mxu0 %vm333_vm7, %v682_v25 }
 0x147   :  { %v683_v26 = vpop.trf.xlu1  ;;  %v715_v34 = vpop.trf.xlu0 }
 0x148   :  { %2435 = vmatprep.mubr.msk.f32.mxu0 %vm333_vm7, %v683_v26 }
 0x14b   :  { %v684_v28 = vpop.trf.xlu1  ;;  %v716_v35 = vpop.trf.xlu0 }
 0x14c   :  { %2436 = vmatmul.mubr.msk.f32.gmra.mrb[14].mxu0 %vm333_vm7, %v684_v28 }
 0x14f   :  { %v685_v30 = vpop.trf.xlu1  ;;  %v717_v38 = vpop.trf.xlu0 }
 0x150   :  { %2438 = vmatprep.mubr.msk.f32.mxu0 %vm333_vm7, %v685_v30 }
 0x153   :  { %v686_v31 = vpop.trf.xlu1  ;;  %v718_v45 = vpop.trf.xlu0 }
 0x154   :  { %2439 = vmatmul.mubr.msk.f32.gmra.mrb[16].mxu0 %vm333_vm7, %v686_v31 }
 0x155   :  { %2441 = vmatprep.mubr.msk.f32.mxu0 %vm333_vm7, %v703_v63 }
 0x158   :  { %2442 = vmatmul.mubr.msk.f32.gmra.mrb[18].mxu0 %vm333_vm7, %v704_v1 }
 0x159   :  { %2444 = vmatprep.mubr.msk.f32.mxu0 %vm333_vm7, %v705_v5 }
 0x15c   :  { %2445 = vmatmul.mubr.msk.f32.gmra.mrb[20].mxu0 %vm333_vm7, %v706_v7 }
 0x15d   :  { %2447 = vmatprep.mubr.msk.f32.mxu0 %vm333_vm7, %v707_v12 }
 0x160   :  { %2448 = vmatmul.mubr.msk.f32.gmra.mrb[22].mxu0 %vm333_vm7, %v708_v14 }
 0x161   :  { %2450 = vmatprep.mubr.msk.f32.mxu0 %vm333_vm7, %v709_v20 }
 0x164   :  { %2451 = vmatmul.mubr.msk.f32.gmra.mrb[24].mxu0 %vm333_vm7, %v710_v22 }
 0x165   :  { %2453 = vmatprep.mubr.msk.f32.mxu0 %vm333_vm7, %v711_v27 }
 0x168   :  { %2454 = vmatmul.mubr.msk.f32.gmra.mrb[26].mxu0 %vm333_vm7, %v712_v29 }
 0x169   :  { %2456 = vmatprep.mubr.msk.f32.mxu0 %vm333_vm7, %v713_v32 }
 0x16c   :  { %2457 = vmatmul.mubr.msk.f32.gmra.mrb[28].mxu0 %vm333_vm7, %v714_v33 }
 0x16d   :  { %2459 = vmatprep.mubr.msk.f32.mxu0 %vm333_vm7, %v715_v34 }
 0x170   :  { %2460 = vmatmul.mubr.msk.f32.gmra.mrb[30].mxu0 %vm333_vm7, %v716_v35 }
 0x171   :  { %v2968_v44 = vpop.permute.xlu1 %1161  ;;  %2462 = vmatprep.mubr.msk.f32.mxu0 %vm333_vm7, %v717_v38 }
 0x172   :  { %vm1185_vm8 = vcmp.eq.s32.totalorder %v2968_v44, %v1180_v40  ;;  %vm1172_vm9 = vcmp.eq.s32.totalorder %v2968_v44, %v1170_v41  ;;  %vm1171_vm10 = vcmp.eq.s32.totalorder %v2968_v44, %v1166_v42 }
 0x173   :  { %v2118_v46 = vsel %vm1185_vm8, 1.0, %v2713_v9  ;;  %v2117_v47 = vsel %vm1172_vm9, 1.0, %v2713_v9  ;;  %v2116_v48 = vsel %vm1171_vm10, 1.0, %v2713_v9 }
 0x174   :  { %1244 = vxpose.xlu1.b32.start.end [1/1] (short) %v2117_v47, 128  ;;  %1212 = vxpose.xlu0.b32.start.end [1/1] (short) %v2116_v48, 128  ;;  %v2977_v49 = vmul.f32 %v2118_v46, %v1195_v43 }
 0x175   :  { %2463 = vmatmul.mubr.msk.f32.gmra.mrb[32].mxu0 %vm333_vm7, %v718_v45 }
 0x1ef   :  { %v2419_v53 = vpop.f32.mrb[2].mxu0 }
 0x1f0   :  { %v1048_v54 = vadd.f32 %v2419_v53, %v2986_v52  ;;  %v881_v55 = vpop.f32.mrb[3].mxu0 }
 0x1f1   :  { %v1047_v56 = vadd.f32 %v2986_v52, %v881_v55 }
 0x1f3   :  { %v2559_v57 = vpack.c.bf16 %v1048_v54, %v1047_v56 }
 0x1f4   :  { %v3007_v20 = vpop.trf.xlu0 }
 0x1f7   :  { %v2422_v58 = vpop.f32.mrb[4].mxu0 }
 0x1f8   :  { %v1050_v59 = vadd.f32 %v2422_v58, %v2986_v52  ;;  %v891_v60 = vpop.f32.mrb[5].mxu0  ;;  %v3015_v27 = vpop.trf.xlu0 }
 0x1f9   :  { %v1049_v61 = vadd.f32 %v2986_v52, %v891_v60 }
 0x1fb   :  { %v2563_v62 = vpack.c.bf16 %v1050_v59, %v1049_v61 }
 0x1fc   :  { %v3022_v32 = vpop.trf.xlu0 }
 0x1ff   :  { %v2425_v63 = vpop.f32.mrb[6].mxu0 }
 0x200   :  { %v1052_v0 = vadd.f32 %v2425_v63, %v2986_v52  ;;  %v901_v1 = vpop.f32.mrb[7].mxu0  ;;  %v3029_v35 = vpop.trf.xlu0 }
 0x201   :  { %v1051_v2 = vadd.f32 %v2986_v52, %v901_v1  ;;  %v3048_v63 = vpop.trf.xlu1 }
 0x203   :  { %v2567_v3 = vpack.c.bf16 %v1052_v0, %v1051_v2 }
 0x204   :  { %v3040_v47 = vpop.trf.xlu0 }
 0x207   :  { %v2428_v5 = vpop.f32.mrb[8].mxu0 }
 0x208   :  { %v2995_v6 = vadd.f32 %v2428_v5, %v2986_v52  ;;  %v911_v7 = vpop.f32.mrb[9].mxu0  ;;  %v3045_v56 = vpop.trf.xlu0 }
 0x209   :  { %v1053_v8 = vadd.f32 %v2986_v52, %v911_v7 }
 0x20b   :  { %v2571_v10 = vpack.c.bf16 %v2995_v6, %v1053_v8  ;;  %v3053_v8 = vpop.trf.xlu1 }
 0x20c   :  { %v1234_v7 = vpop.trf.xlu0 }
 0x20f   :  { %v2431_v12 = vpop.f32.mrb[10].mxu0 }
 0x210   :  { %v3000_v13 = vadd.f32 %v2431_v12, %v2986_v52  ;;  %v921_v14 = vpop.f32.mrb[11].mxu0 }
 0x211   :  { %v3003_v15 = vadd.f32 %v2986_v52, %v921_v14 }
 0x213   :  { %v2575_v19 = vpack.c.bf16 %v3000_v13, %v3003_v15 }
 0x217   :  { %v2434_v21 = vpop.f32.mrb[12].mxu0 }
 0x218   :  { %v3010_v22 = vadd.f32 %v2434_v21, %v2986_v52  ;;  %v931_v25 = vpop.f32.mrb[13].mxu0 }
 0x219   :  { %v3013_v26 = vadd.f32 %v2986_v52, %v931_v25 }
 0x21b   :  { %v2579_v28 = vpack.c.bf16 %v3010_v22, %v3013_v26  ;;  %v1204_v22 = vld [vmem:[#allocation5] sm:$0xff] }
 0x21f   :  { %v2437_v29 = vpop.f32.mrb[14].mxu0 }
 0x220   :  { %v3020_v30 = vadd.f32 %v2437_v29, %v2986_v52  ;;  %v941_v31 = vpop.f32.mrb[15].mxu0 }
 0x221   :  { %v3025_v33 = vadd.f32 %v2986_v52, %v941_v31 }
 0x223   :  { %v2583_v34 = vpack.c.bf16 %v3020_v30, %v3025_v33 }
 0x227   :  { %v2440_v37 = vpop.f32.mrb[16].mxu0 }
 0x228   :  { %v3032_v38 = vadd.f32 %v2440_v37, %v2986_v52  ;;  %v951_v40 = vpop.f32.mrb[17].mxu0 }
 0x229   :  { %v3035_v41 = vadd.f32 %v2986_v52, %v951_v40 }
 0x22b   :  { %v2587_v42 = vpack.c.bf16 %v3032_v38, %v3035_v41  ;;  %v2443_v43 = vpop.f32.mrb[18].mxu0 }
 0x22c   :  { %v1064_v45 = vadd.f32 %v2443_v43, %v2986_v52  ;;  %v961_v46 = vpop.f32.mrb[19].mxu0 }
 0x22d   :  { %v1063_v48 = vadd.f32 %v2986_v52, %v961_v46 }
 0x22f   :  { %v2557_v50 = vpack.c.bf16 %v1064_v45, %v1063_v48  ;;  %v2446_v51 = vpop.f32.mrb[20].mxu0  ;;  %v1262_v45 = vpop.trf.xlu1 }
 0x230   :  { %v1066_v53 = vadd.f32 %v2446_v51, %v2986_v52  ;;  %v971_v54 = vpop.f32.mrb[21].mxu0 }
 0x231   :  { %v1065_v55 = vadd.f32 %v2986_v52, %v971_v54  ;;  %2558 = vmatprep.subr.bf16.mxu1 %v2557_v50 }
 0x232   :  { %2560 = vmatpush3.bf16.msra.mxu1 %v2559_v57 }
 0x233   :  { %v2561_v58 = vpack.c.bf16 %v1066_v53, %v1065_v55  ;;  %v2449_v59 = vpop.f32.mrb[22].mxu0  ;;  %v1263_v54 = vpop.trf.xlu1 }
 0x234   :  { %v1068_v60 = vadd.f32 %v2449_v59, %v2986_v52  ;;  %v981_v61 = vpop.f32.mrb[23].mxu0 }
 0x235   :  { %v1067_v0 = vadd.f32 %v2986_v52, %v981_v61  ;;  %2562 = vmatprep.subr.bf16.mxu1 %v2561_v58  ;;  %v254_v61 = vrot.slane %v2868_v18, %v2859_v16 }
 0x236   :  { %2564 = vmatpush3.bf16.msra.mxu1 %v2563_v62  ;;  %v1235_v62 = vpop.trf.xlu0 }
 0x237   :  { %v2565_v1 = vpack.c.bf16 %v1068_v60, %v1067_v0  ;;  %v2452_v2 = vpop.f32.mrb[24].mxu0  ;;  %v1264_v26 = vpop.trf.xlu1  ;;  %vm259_vm12 = vcmp.eq.s32.totalorder %v2877_v23, %v254_v61 }
 0x238   :  { %v1070_v5 = vadd.f32 %v2452_v2, %v2986_v52  ;;  %v991_v6 = vpop.f32.mrb[25].mxu0  ;;  %v1079_v2 = vld [vmem:[#allocation2] sm:$0xff] }
 0x239   :  { %v1069_v57 = vadd.f32 %v2986_v52, %v991_v6  ;;  %2566 = vmatprep.subr.bf16.mxu1 %v2565_v1  ;;  %v3128_v6 = vld [vmem:[%s3256_s11] ss:$0 sm:$0xff] }
 0x23a   :  { %2568 = vmatpush3.bf16.msra.mxu1 %v2567_v3 }
 0x23b   :  { %v2569_v12 = vpack.c.bf16 %v1070_v5, %v1069_v57  ;;  %v2455_v14 = vpop.f32.mrb[26].mxu0 }
 0x23c   :  { %v1072_v21 = vadd.f32 %v2455_v14, %v2986_v52  ;;  %v1001_v25 = vpop.f32.mrb[27].mxu0 }
 0x23d   :  { %v1071_v29 = vadd.f32 %v2986_v52, %v1001_v25  ;;  %2570 = vmatprep.subr.bf16.mxu1 %v2569_v12 }
 0x23e   :  { %2572 = vmatpush3.bf16.msra.mxu1 %v2571_v10  ;;  %v1236_v10 = vpop.trf.xlu0 }
 0x23f   :  { %v2573_v31 = vpack.c.bf16 %v1072_v21, %v1071_v29  ;;  %v2458_v37 = vpop.f32.mrb[28].mxu0 }
 0x240   :  { %v1074_v40 = vadd.f32 %v2458_v37, %v2986_v52  ;;  %v1011_v43 = vpop.f32.mrb[29].mxu0 }
 0x241   :  { %v1073_v3 = vadd.f32 %v2986_v52, %v1011_v43  ;;  %2574 = vmatprep.subr.bf16.mxu1 %v2573_v31 }
 0x242   :  { %2576 = vmatpush3.bf16.msra.mxu1 %v2575_v19  ;;  %v1237_v19 = vpop.trf.xlu0 }
 0x243   :  { %v2577_v46 = vpack.c.bf16 %v1074_v40, %v1073_v3  ;;  %v2461_v48 = vpop.f32.mrb[30].mxu0 }
 0x244   :  { %v1076_v50 = vadd.f32 %v2461_v48, %v2986_v52  ;;  %v1021_v51 = vpop.f32.mrb[31].mxu0 }
 0x245   :  { %v1075_v53 = vadd.f32 %v2986_v52, %v1021_v51  ;;  %2578 = vmatprep.subr.bf16.mxu1 %v2577_v46 }
 0x246   :  { %2580 = vmatpush3.bf16.msra.mxu1 %v2579_v28  ;;  %v1265_v28 = vpop.trf.xlu1 }
 0x247   :  { %v2581_v55 = vpack.c.bf16 %v1076_v50, %v1075_v53 }
 0x248   :  { %v2464_v58 = vpop.f32.mrb[32].mxu0 }
 0x249   :  { %v1078_v59 = vadd.f32 %v2464_v58, %v2986_v52  ;;  %v1031_v13 = vpop.f32.mrb[33].mxu0  ;;  %2582 = vmatprep.subr.bf16.mxu1 %v2581_v55 }
 0x24a   :  { %v1077_v15 = vadd.f32 %v2986_v52, %v1031_v13  ;;  %2584 = vmatpush3.bf16.msra.mxu1 %v2583_v34  ;;  %v1238_v52 = vpop.trf.xlu0  ;;  %v1266_v18 = vpop.trf.xlu1 }
 0x24c   :  { %v2585_v60 = vpack.c.bf16 %v1078_v59, %v1077_v15 }
 0x24e   :  { %2586 = vmatprep.subr.bf16.mxu1 %v2585_v60  ;;  %v1239_v16 = vpop.trf.xlu0 }
 0x24f   :  { %2588 = vmatpush3.bf16.msra.mxu1 %v2587_v42  ;;  %v1184_v42 = vrot.slane %v2949_v36, %v2861_v17 }
 0x250   :  { %2465 = vmatprep.subr.mxu1 %v1204_v22 }
 0x251   :  { %vm1186_vm13 = vcmp.eq.s32.totalorder %v2968_v44, %v1184_v42 }
 0x252   :  { %2115 = vmatmul.mubr.msk.f32.vlgmr.msra.gmra.mrb[2].mxu1 %vm259_vm12, %v2714_v24  ;;  %v1240_v23 = vpop.trf.xlu0  ;;  %v1267_v24 = vpop.trf.xlu1 }
 0x253   :  { %2467 = vmatprep.mubr.msk.f32.mxu1 %vm333_vm7, %v3007_v20  ;;  %2466 = vmatpush3.msra.mxu1 %v1204_v22 }
 0x256   :  { %2468 = vmatmul.mubr.msk.f32.vlgmr.msra.gmra.mrb[4].mxu1 %vm333_vm7, %v3015_v27  ;;  %v1241_v20 = vpop.trf.xlu0  ;;  %v1268_v27 = vpop.trf.xlu1 }
 0x257   :  { %2470 = vmatprep.mubr.msk.f32.mxu1 %vm333_vm7, %v3022_v32 }
 0x25a   :  { %2471 = vmatmul.mubr.msk.f32.gmra.mrb[6].mxu1 %vm333_vm7, %v3029_v35  ;;  %v1242_v30 = vpop.trf.xlu0  ;;  %v1269_v32 = vpop.trf.xlu1 }
 0x25b   :  { %2473 = vmatprep.mubr.msk.f32.mxu1 %vm333_vm7, %v3040_v47 }
 0x25e   :  { %2474 = vmatmul.mubr.msk.f32.gmra.mrb[8].mxu1 %vm333_vm7, %v3045_v56  ;;  %v1243_v33 = vpop.trf.xlu0  ;;  %v1270_v34 = vpop.trf.xlu1  ;;  %v1199_v56 = vrot.slane %v2958_v39, %v2861_v17 }
 0x25f   :  { %2476 = vmatprep.mubr.msk.f32.mxu1 %vm333_vm7, %v1234_v7 }
 0x262   :  { %2477 = vmatmul.mubr.msk.f32.gmra.mrb[10].mxu1 %vm333_vm7, %v1235_v62  ;;  %v1271_v35 = vpop.trf.xlu1 }
 0x263   :  { %2479 = vmatprep.mubr.msk.f32.mxu1 %vm333_vm7, %v1236_v10 }
 0x266   :  { %2480 = vmatmul.mubr.msk.f32.gmra.mrb[12].mxu1 %vm333_vm7, %v1237_v19  ;;  %v1272_v38 = vpop.trf.xlu1 }
 0x267   :  { %2482 = vmatprep.mubr.msk.f32.mxu1 %vm333_vm7, %v1238_v52 }
 0x26a   :  { %2483 = vmatmul.mubr.msk.f32.gmra.mrb[14].mxu1 %vm333_vm7, %v1239_v16  ;;  %v1273_v41 = vpop.trf.xlu1 }
 0x26b   :  { %2485 = vmatprep.mubr.msk.f32.mxu1 %vm333_vm7, %v1240_v23 }
 0x26e   :  { %2486 = vmatmul.mubr.msk.f32.gmra.mrb[16].mxu1 %vm333_vm7, %v1241_v20  ;;  %v1274_v47 = vpop.trf.xlu1 }
 0x26f   :  { %2488 = vmatprep.mubr.msk.f32.mxu1 %vm333_vm7, %v1242_v30 }
 0x272   :  { %2489 = vmatmul.mubr.msk.f32.gmra.mrb[18].mxu1 %vm333_vm7, %v1243_v33  ;;  %v1275_v0 = vpop.trf.xlu1 }
 0x273   :  { %2491 = vmatprep.mubr.msk.f32.mxu1 %vm333_vm7, %v3048_v63  ;;  %v2119_v63 = vsel %vm1186_vm13, 1.0, %v2713_v9 }
 0x274   :  { %v1203_v36 = vmul.f32 %v2119_v63, %v1199_v56 }
 0x276   :  { %2492 = vmatmul.mubr.msk.f32.gmra.mrb[20].mxu1 %vm333_vm7, %v3053_v8 }
 0x277   :  { %2494 = vmatprep.mubr.msk.f32.mxu1 %vm333_vm7, %v1262_v45 }
 0x27a   :  { %2495 = vmatmul.mubr.msk.f32.gmra.mrb[22].mxu1 %vm333_vm7, %v1263_v54 }
 0x27b   :  { %2497 = vmatprep.mubr.msk.f32.mxu1 %vm333_vm7, %v1264_v26 }
 0x27e   :  { %2498 = vmatmul.mubr.msk.f32.gmra.mrb[24].mxu1 %vm333_vm7, %v1265_v28 }
 0x27f   :  { %2500 = vmatprep.mubr.msk.f32.mxu1 %vm333_vm7, %v1266_v18 }
 0x282   :  { %2501 = vmatmul.mubr.msk.f32.gmra.mrb[26].mxu1 %vm333_vm7, %v1267_v24 }
 0x283   :  { %2503 = vmatprep.mubr.msk.f32.mxu1 %vm333_vm7, %v1268_v27 }
 0x286   :  { %2504 = vmatmul.mubr.msk.f32.gmra.mrb[28].mxu1 %vm333_vm7, %v1269_v32 }
 0x287   :  { %2506 = vmatprep.mubr.msk.f32.mxu1 %vm333_vm7, %v1270_v34 }
 0x28a   :  { %2507 = vmatmul.mubr.msk.f32.gmra.mrb[30].mxu1 %vm333_vm7, %v1271_v35 }
 0x28b   :  { %2509 = vmatprep.mubr.msk.f32.mxu1 %vm333_vm7, %v1272_v38 }
 0x28e   :  { %2510 = vmatmul.mubr.msk.f32.gmra.mrb[32].mxu1 %vm333_vm7, %v1273_v41 }
 0x28f   :  { %2512 = vmatprep.mubr.msk.f32.mxu1 %vm333_vm7, %v1274_v47 }
 0x292   :  { %2513 = vmatmul.mubr.msk.f32.gmra.mrb[34].mxu1 %vm333_vm7, %v1275_v0 }
 0x293   :  { %1663 = vmatprep.mubr.f32.mxu1 %v1203_v36 }
 0x325   :  { %v2264_v1 = vpop.f32.mrb[2].mxu1 }
 0x326   :  { %v2265_v5 = vpop.f32.mrb[3].mxu1 }
 0x327   :  { %v2266_v44 = vadd.f32 %v2265_v5, %v2264_v1 }
 0x329   :  { %v1150_v17 = vadd.f32 %v2266_v44, %v1079_v2  ;;  %v2469_v39 = vpop.f32.mrb[4].mxu1 }
 0x32a   :  { %v1445_v7 = vadd.f32 %v2469_v39, %v3128_v6  ;;  %v1439_v57 = vpop.f32.mrb[5].mxu1 }
 0x32b   :  { %1152 = vst.msk [vmem:[#allocation2] sm:$0xff] %vm67_vm3, %v1150_v17  ;;  %v1440_v8 = vadd.f32 %v3128_v6, %v1439_v57 }
 0x32d   :  { %v2591_v12 = vpack.c.bf16 %v1445_v7, %v1440_v8  ;;  %v2472_v14 = vpop.f32.mrb[6].mxu1 }
 0x32e   :  { %v1455_v21 = vadd.f32 %v2472_v14, %v3128_v6  ;;  %v1449_v25 = vpop.f32.mrb[7].mxu1 }
 0x32f   :  { %v1450_v29 = vadd.f32 %v3128_v6, %v1449_v25 }
 0x331   :  { %v2595_v62 = vpack.c.bf16 %v1455_v21, %v1450_v29  ;;  %v2475_v31 = vpop.f32.mrb[8].mxu1 }
 0x332   :  { %v1465_v37 = vadd.f32 %v2475_v31, %v3128_v6  ;;  %v1459_v40 = vpop.f32.mrb[9].mxu1 }
 0x333   :  { %v1460_v43 = vadd.f32 %v3128_v6, %v1459_v40 }
 0x335   :  { %v2599_v45 = vpack.c.bf16 %v1465_v37, %v1460_v43  ;;  %v2478_v3 = vpop.f32.mrb[10].mxu1 }
 0x336   :  { %v1475_v46 = vadd.f32 %v2478_v3, %v3128_v6  ;;  %v1469_v48 = vpop.f32.mrb[11].mxu1 }
 0x337   :  { %v1470_v50 = vadd.f32 %v3128_v6, %v1469_v48 }
 0x339   :  { %v2603_v51 = vpack.c.bf16 %v1475_v46, %v1470_v50  ;;  %v2481_v10 = vpop.f32.mrb[12].mxu1 }
 0x33a   :  { %v1485_v53 = vadd.f32 %v2481_v10, %v3128_v6  ;;  %v1479_v54 = vpop.f32.mrb[13].mxu1 }
 0x33b   :  { %v1480_v55 = vadd.f32 %v3128_v6, %v1479_v54  ;;  %v1677_v54 = vld [vmem:[%s3257_s12 + $0x8] sm:$0xff] }
 0x33d   :  { %v2607_v58 = vpack.c.bf16 %v1485_v53, %v1480_v55  ;;  %v2484_v59 = vpop.f32.mrb[14].mxu1  ;;  %v1676_v53 = vld [vmem:[%s3257_s12] sm:$0xff] }
 0x33e   :  { %v1495_v13 = vadd.f32 %v2484_v59, %v3128_v6  ;;  %v1489_v15 = vpop.f32.mrb[15].mxu1  ;;  %v2622_v55 = vpack.c.bf16 %v1677_v54, %v1676_v53  ;;  %v1598_v59 = vld [vmem:[#allocation3] sm:$0xff] }
 0x33f   :  { %v1490_v19 = vadd.f32 %v3128_v6, %v1489_v15 }
 0x341   :  { %v2611_v60 = vpack.c.bf16 %v1495_v13, %v1490_v19  ;;  %v2487_v61 = vpop.f32.mrb[16].mxu1 }
 0x342   :  { %v1505_v22 = vadd.f32 %v2487_v61, %v3128_v6  ;;  %v1499_v26 = vpop.f32.mrb[17].mxu1 }
 0x343   :  { %v1500_v52 = vadd.f32 %v3128_v6, %v1499_v26 }
 0x345   :  { %v2615_v28 = vpack.c.bf16 %v1505_v22, %v1500_v52  ;;  %v2490_v16 = vpop.f32.mrb[18].mxu1  ;;  %v1783_v52 = vld [vmem:[%s3260_s15 + $0x8] sm:$0xff] }
 0x346   :  { %v1515_v18 = vadd.f32 %v2490_v16, %v3128_v6  ;;  %v1509_v23 = vpop.f32.mrb[19].mxu1 }
 0x347   :  { %v1510_v24 = vadd.f32 %v3128_v6, %v1509_v23 }
 0x349   :  { %v2619_v20 = vpack.c.bf16 %v1515_v18, %v1510_v24  ;;  %v2493_v27 = vpop.f32.mrb[20].mxu1  ;;  %v1785_v18 = vld [vmem:[%s3260_s15 + $0x18] sm:$0xff] }
 0x34a   :  { %v1525_v30 = vadd.f32 %v2493_v27, %v3128_v6  ;;  %v1519_v32 = vpop.f32.mrb[21].mxu1  ;;  %v2153_v27 = vld [vmem:[%s3258_s13] ss:$0 sm:$0xff] }
 0x34b   :  { %v1520_v33 = vadd.f32 %v3128_v6, %v1519_v32 }
 0x34d   :  { %v2589_v34 = vpack.c.bf16 %v1525_v30, %v1520_v33  ;;  %v2496_v35 = vpop.f32.mrb[22].mxu1 }
 0x34e   :  { %v1535_v38 = vadd.f32 %v2496_v35, %v3128_v6  ;;  %v1529_v41 = vpop.f32.mrb[23].mxu1  ;;  %v1778_v35 = vld [vmem:[%s3259_s14] sm:$0xff] }
 0x34f   :  { %v1530_v42 = vadd.f32 %v3128_v6, %v1529_v41  ;;  %2590 = vmatprep.subr.bf16.mxu1 %v2589_v34 }
 0x350   :  { %2592 = vmatpush3.bf16.msra.mxu1 %v2591_v12 }
 0x351   :  { %v2593_v47 = vpack.c.bf16 %v1535_v38, %v1530_v42  ;;  %v2499_v56 = vpop.f32.mrb[24].mxu1  ;;  %v1779_v38 = vld [vmem:[%s3259_s14 + $0x8] sm:$0xff]  ;;  %v1780_v42 = vld [vmem:[%s3259_s14 + $0x10] sm:$0xff] }
 0x352   :  { %v1545_v63 = vadd.f32 %v2499_v56, %v3128_v6  ;;  %v1539_v0 = vpop.f32.mrb[25].mxu1  ;;  %v2631_v41 = vpack.c.bf16 %v1779_v38, %v1778_v35 }
 0x353   :  { %v1540_v36 = vadd.f32 %v3128_v6, %v1539_v0  ;;  %2594 = vmatprep.subr.bf16.mxu1 %v2593_v47  ;;  %v1781_v47 = vld [vmem:[%s3259_s14 + $0x18] sm:$0xff] }
 0x354   :  { %2596 = vmatpush3.bf16.msra.mxu1 %v2595_v62  ;;  %v2634_v0 = vpack.c.bf16 %v1781_v47, %v1780_v42 }
 0x355   :  { %v2597_v1 = vpack.c.bf16 %v1545_v63, %v1540_v36  ;;  %v2502_v2 = vpop.f32.mrb[26].mxu1  ;;  %v1759_v63 = vld [vmem:[#allocation2] sm:$0xff] }
 0x356   :  { %v1555_v5 = vadd.f32 %v2502_v2, %v3128_v6  ;;  %v1549_v44 = vpop.f32.mrb[27].mxu1  ;;  %v1944_v2 = vld [vmem:[%s3262_s17] sm:$0xff] }
 0x357   :  { %v1550_v17 = vadd.f32 %v3128_v6, %v1549_v44  ;;  %2598 = vmatprep.subr.bf16.mxu1 %v2597_v1 }
 0x358   :  { %2600 = vmatpush3.bf16.msra.mxu1 %v2599_v45 }
 0x359   :  { %v2601_v39 = vpack.c.bf16 %v1555_v5, %v1550_v17  ;;  %v2505_v7 = vpop.f32.mrb[28].mxu1  ;;  %v1945_v5 = vld [vmem:[%s3262_s17 + $0x8] sm:$0xff]  ;;  %s2718_s17 = smov [#allocation7]  }
 0x35a   :  { %v1565_v57 = vadd.f32 %v2505_v7, %v3128_v6  ;;  %v1559_v8 = vpop.f32.mrb[29].mxu1  ;;  %v2637_v44 = vpack.c.bf16 %v1945_v5, %v1944_v2  ;;  %s2035_s0 = sshll.u32 %s2718_s17, 4  ;;  %s2036_s0 = int_to_ptr.vmem [resolvable:$true] %s2035_s0 }
 0x35b   :  { %v1560_v12 = vadd.f32 %v3128_v6, %v1559_v8  ;;  %2602 = vmatprep.subr.bf16.mxu1 %v2601_v39  ;;  %p2691_p1 = scmp.lt.s32.totalorder %s2036_s0, %s2036_s0 }
 0x35c   :  { %2604 = vmatpush3.bf16.msra.mxu1 %v2603_v51 }
 0x35d   :  { %v2605_v14 = vpack.c.bf16 %v1565_v57, %v1560_v12  ;;  %v2508_v21 = vpop.f32.mrb[30].mxu1 }
 0x35e   :  { %v1575_v25 = vadd.f32 %v2508_v21, %v3128_v6  ;;  %v1569_v29 = vpop.f32.mrb[31].mxu1 }
 0x35f   :  { %v1570_v62 = vadd.f32 %v3128_v6, %v1569_v29  ;;  %2606 = vmatprep.subr.bf16.mxu1 %v2605_v14  ;;  %v2158_v14 = vld [vmem:[%s3263_s18] ss:$0 sm:$0xff] }
 0x360   :  { %2608 = vmatpush3.bf16.msra.mxu1 %v2607_v58 }
 0x361   :  { %v2609_v31 = vpack.c.bf16 %v1575_v25, %v1570_v62  ;;  %v2511_v37 = vpop.f32.mrb[32].mxu1 }
 0x362   :  { %v1585_v40 = vadd.f32 %v2511_v37, %v3128_v6  ;;  %v1579_v43 = vpop.f32.mrb[33].mxu1 }
 0x363   :  { %v1580_v45 = vadd.f32 %v3128_v6, %v1579_v43  ;;  %2610 = vmatprep.subr.bf16.mxu1 %v2609_v31  ;;  %v2685_v31 = vld [vmem:[%s3272_s27] sm:$0xff] }
 0x364   :  { %2612 = vmatpush3.bf16.msra.mxu1 %v2611_v60 }
 0x365   :  { %v2613_v3 = vpack.c.bf16 %v1585_v40, %v1580_v45  ;;  %v2514_v46 = vpop.f32.mrb[34].mxu1 }
 0x366   :  { %v1595_v48 = vadd.f32 %v2514_v46, %v3128_v6  ;;  %v1589_v50 = vpop.f32.mrb[35].mxu1 }
 0x367   :  { %v1590_v51 = vadd.f32 %v3128_v6, %v1589_v50  ;;  %2614 = vmatprep.subr.bf16.mxu1 %v2613_v3  ;;  %v2715_v6 = vmov 32  }
 0x368   :  { %2616 = vmatpush3.bf16.msra.mxu1 %v2615_v28  ;;  %2682 = vset.pattern.permute.xlu0 %v2715_v6  ;;  %v1784_v28 = vld [vmem:[%s3260_s15 + $0x10] sm:$0xff] }
 0x369   :  { %v2617_v10 = vpack.c.bf16 %v1595_v48, %v1590_v51  ;;  %v2628_v23 = vpack.c.bf16 %v1785_v18, %v1784_v28 }
 0x36b   :  { %2618 = vmatprep.subr.bf16.mxu1 %v2617_v10 }
 0x36c   :  { %2620 = vmatpush3.bf16.msra.mxu1 %v2619_v20 }
 0x36d   :  { %2621 = vmatprep.subr.bf16.mxu1 %v2711_v4 }
 0x36f   :  { %1664 = vmatmul.mubr.f32.vlgmr.msra.gmra.mrb[36].mxu1 %v2977_v49 }
 0x370   :  { %2623 = vmatpush3.bf16.msra.mxu1 %v2622_v55  ;;  %2519 = vmatprep.mubr.msk.f32.mxu1 %vm2712_vm1, %v2713_v9 }
 0x371   :  { %2624 = vmatprep.subr.bf16.mxu1 %v2711_v4 }
 0x373   :  { %2520 = vmatmul.mubr.msk.f32.vlgmr.msra.gmra.mrb[38].mxu1 %vm78_vm2, %v2840_v11  ;;  %v1782_v11 = vld [vmem:[%s3260_s15] sm:$0xff]  ;;  %s2717_s15 = smov 96  }
 0x374   :  { %2530 = vmatprep.mubr.msk.f32.mxu1 %vm2712_vm1, %v2713_v9  ;;  %v2625_v16 = vpack.c.bf16 %v1783_v52, %v1782_v11 }
 0x376   :  { %2626 = vmatpush3.bf16.msra.mxu1 %v2625_v16 }
 0x377   :  { %2627 = vmatprep.subr.bf16.mxu1 %v2711_v4 }
 0x37a   :  { %2629 = vmatpush3.bf16.msra.mxu1 %v2628_v23 }
 0x37b   :  { %2630 = vmatprep.subr.bf16.mxu1 %v2711_v4 }
 0x442   :  { %v2332_v58 = vpop.f32.mrb[36].mxu1 }
 0x443   :  { %v2333_v13 = vpop.f32.mrb[37].mxu1 }
 0x444   :  { %v2334_v15 = vadd.f32 %v2333_v13, %v2332_v58 }
 0x446   :  { %v1669_v19 = vadd.f32 %v2334_v15, %v1598_v59  ;;  %v1755_v49 = vpop.f32.mrb[38].mxu1 }
 0x447   :  { %v2521_v60 = vpop.f32.mrb[39].mxu1  ;;  %v1756_v30 = vadd.f32 %v2153_v27, %v1755_v49 }
 0x448   :  { %1671 = vst.msk [vmem:[#allocation3] sm:$0xff] %vm69_vm11, %v1669_v19 }
 0x449   :  { %v1760_v36 = vadd.f32 %v1759_v63, %v1756_v30 }
 0x44b   :  { %v1761_v1 = vmax.f32 %v1760_v36, 0.0 }
 0x44f   :  { %v1762_v61 = vld [vmem:[#allocation3] sm:$0xff] }
 0x450   :  { %vm1763_vm14 = vcmp.eq.f32.partialorder %v1762_v61, 0.0 }
 0x451   :  { %v1764_v22 = vsel %vm1763_vm14, 1.0, %v1762_v61 }
 0x452   :  { %1767 = vperm.xlu0 %2682, %v1764_v22  }
 0x4d1   :  { %v1768_v26 = vpop.permute.xlu0 %1767 }
 0x4d2   :  { %2683 = vrcp.f32 %v1768_v26 }
 0x4dc   :  { %v2684_v24 = vpop.eup %2683 }
 0x4dd   :  { %v1771_v20 = vmul.f32 %v2684_v24, %v1762_v61 }
 0x4df   :  { %1773 = vrot.lane.b32.xlu1 %v1771_v20, %s2716_s2 }
 0x551   :  { %v1774_v32 = vpop.permute.xlu1 %1773 }
 0x552   :  { %v1776_v33 = vadd.f32 %v1774_v32, %v1756_v30 }
 0x554   :  { %v1777_v34 = vmax.f32 %v1776_v33, 0.0 }
 0x556   :  { %1787 = vrot.lane.b32.xlu0 %v1777_v34, %s2717_s15 }
 0x5c8   :  { %v1788_v56 = vpop.permute.xlu0 %1787 }
 0x5c9   :  { %2531 = vmatmul.mubr.msk.f32.vlgmr.msra.gmra.mrb[40].mxu1 %vm67_vm3, %v1788_v56 }
 0x5ca   :  { %2632 = vmatpush3.bf16.msra.mxu1 %v2631_v41  ;;  %2541 = vmatprep.mubr.msk.f32.mxu1 %vm2712_vm1, %v2713_v9 }
 0x5cb   :  { %2633 = vmatprep.subr.bf16.mxu1 %v2711_v4 }
 0x5ce   :  { %2635 = vmatpush3.bf16.msra.mxu1 %v2634_v0 }
 0x5cf   :  { %2636 = vmatprep.subr.bf16.mxu1 %v2711_v4  ;;  %v2157_v4 = vld [vmem:[%s3261_s16] ss:$0 sm:$0xff]  ;;  %s2686_s16 = scalar_lea.vmem %s2036_s0, 128 }
 0x5d0   :  { %p2687_p0 = scmp.ne.s32.totalorder %s2036_s0, %s2686_s16  ;;  %p2692_p2 = scmp.lt.s32.totalorder %s2686_s16, %s2686_s16 }
 0x5d1   :  { %2542 = vmatmul.mubr.msk.f32.vlgmr.msra.gmra.mrb[42].mxu1 %vm67_vm3, %v1761_v1 }
 0x5d2   :  { %2548 = vmatprep.mubr.msk.f32.mxu1 %vm2712_vm1, %v2713_v9  ;;  %2638 = vmatpush3.bf16.msra.mxu1 %v2637_v44  ;;  %p2693_p3 = por %p2692_p2, %p2691_p1 }
 0x5d4   :  { %p2694_p4 = pnand %p2693_p3, %p2687_p0 }
 0x69c   :  { %v1858_v17 = vpop.f32.mrb[40].mxu1 }
 0x69d   :  { %v2532_v39 = vpop.f32.mrb[41].mxu1 }
 0x6a4   :  { %v1931_v7 = vpop.f32.mrb[42].mxu1 }
 0x6a5   :  { %v1932_v57 = vadd.f32 %v1931_v7, %v1858_v17  ;;  %v2543_v8 = vpop.f32.mrb[43].mxu1 }
 0x6a7   :  { %v1942_v9 = vadd.f32 %v2157_v4, %v1932_v57 }
 0x6a9   :  { %v1943_v12 = vmax.f32 %v1942_v9, 0.0 }
 0x6ab   :  { %2549 = vmatmul.mubr.msk.f32.vlgmr.msra.gmra.mrb[44].mxu1 %vm78_vm2, %v1943_v12 }
 0x77e   :  { %v2022_v21 = vpop.f32.mrb[44].mxu1 }
 0x77f   :  { %v2023_v25 = vadd.f32 %v2158_v14, %v2022_v21  ;;  %v2550_v29 = vpop.f32.mrb[45].mxu1 }
 0x781   :  { %v2026_v62 = vmax.f32 %v2023_v25, 0.0 }
 0x783   :  { %v2027_v37 = vadd.f32 %v2685_v31, %v2026_v62 }
 0x785   :  { %2028 = vst.msk [vmem:[#allocation7] sm:$0xff] %vm78_vm2, %v2027_v37 }
 0x786   :  { %2697 = shalt.err (!%p2694_p4)
}
 0x787   :  { %s2698_s1 = scalar_lea.hbm %s3264_s19, 128 }
 0x788   :  { %p2699_p5 = scmp.ne.s32.totalorder %s3264_s19, %s2698_s1  ;;  %p2702_p6 = scmp.lt.u32.totalorder %s2698_s1, %s3264_s19 }
 0x78a   :  { %p2704_p7 = pnand %p2702_p6, %p2699_p5 }
 0x78c   :  { %2707 = shalt.err (!%p2704_p7)
}
 0x78d   :  { %2038 = dma.vmem_to_hbm [thread:$0]  %s2036_s0, 128, %s3264_s19, [#allocation8]  }
 0x78e   :  { %2708 = dma.done.wait [#allocation8], 128  }
 0x78f   :  { %2709 = vsyncadd [#allocation8], 4294967168 }
 0x790   :  { %2042 = vsyncpa [#allocation8], 1 }

</bundles_post_ra>
